<compile_context>
chip_gen: v7x
topology: tpu7x:2x2x1
jax: 0.10.0
libtpu: 0.0.40
codegen_flags: <defaults>
</compile_context>

<pallas_src>
import functools

import numpy as np
import jax
import jax.numpy as jnp
from jax.experimental import pallas as pl
from jax.experimental.pallas import tpu as pltpu


# ---------------------------------------------------------------------------
# Host-side constants (layout plumbing only).
# ---------------------------------------------------------------------------
def _build_constants(B, H, W):
    H2, W2 = (H + 1) // 2, (W + 1) // 2
    Wp1, Wp2 = W + 2, W2 + 2
    L1, L2 = (H + 2) * Wp1, (H2 + 2) * Wp2

    def interior(Hh, Ww, Wp, L):
        i = np.arange(L)
        r, c = i // Wp, i % Wp
        return ((r >= 1) & (r <= Hh) & (c >= 1) & (c <= Ww)).astype(np.float32)

    int1 = interior(H, W, Wp1, L1)
    int2 = interior(H2, W2, Wp2, L2)

    # Additive "-inf" halo for the maxpool (finite so 0*(-1e30)==0 stays exact
    # in the f32 subsample matmul).  Shape (1, B*L1): broadcast over channels.
    hneg = np.tile((1.0 - int1) * -1e30, B)[None, :].astype(np.float32)
    # Interior (0/1) mask of the pooled padded-flat layout, (1, B*L2).
    m2 = np.tile(int2, B)[None, :].astype(np.float32)

    # Block-diagonal stride-2 subsample matrix: column (b, oh+1, ow+1) picks the
    # padded-flat index of the 3x3/stride-2 window centre (2*oh+1, 2*ow+1) of
    # image b; halo columns are all-zero so the pooled map comes out with the
    # zero halo the next conv needs.
    # TODO(synk): this dense (B*L1, B*L2) gather does not scale to full IMPALA
    # resolutions / large B on v7x's 64 MiB VMEM; switch to strided-lane
    # subsampling (pl.ds(..., stride=2)) or a per-row (Wp1, Wp2) selector there.
    sel = np.zeros((B * L1, B * L2), np.float32)
    for b in range(B):
        for oh in range(H2):
            for ow in range(W2):
                i = (2 * oh + 1) * Wp1 + (2 * ow + 1)
                r = (oh + 1) * Wp2 + (ow + 1)
                sel[b * L1 + i, b * L2 + r] = 1.0
    return jnp.asarray(hneg), jnp.asarray(m2), jnp.asarray(sel)


def _vmem_estimate(B, Cin_p, Cout, L1, L2, M1, M2):
    f = 4  # f32 bytes
    est = 0
    est += 2 * Cin_p * (B * L1 + 2 * M1) * f          # input block (double-buffered)
    est += 2 * Cout * (B * L2) * f                    # output block (double-buffered)
    est += 2 * (B * L1) * (B * L2) * f                # SEL (conservatively x2)
    est += 2 * (Cout * 9 * Cin_p + Cout + 4 * Cout * 9 * Cout + 4 * Cout
                + B * L1 + B * L2) * f                # weights / biases / masks
    est += 9 * Cin_p * B * L1 * f                     # pat1
    est += 9 * Cout * B * L2 * f                      # pat2
    est += Cout * (B * L1 + 2 * M1) * f               # maxpool shift buffer
    est += Cout * (B * L2 + 2 * M2) * f               # residual shift buffer
    return est


def _choose_batch(N, Cin_p, Cout, L1, L2, M1, M2, lane_target, vmem_budget):
    # lane-density target for the matmul N dimension / output stores
    b_lanes = max(1, -(-lane_target // L1))
    best = 1
    for B in range(1, min(N, b_lanes) + 1):
        if N % B:
            continue
        if _vmem_estimate(B, Cin_p, Cout, L1, L2, M1, M2) > vmem_budget:
            continue
        best = B
    # keep >= 2 grid steps when N allows: both v7x TensorCores get work and the
    # BlockSpec pipeline has something to overlap.
    if N // best < 2:
        cands = [d for d in range(1, best) if N % d == 0 and N // d >= 2]
        if cands:
            best = max(cands)
    return best


# ---------------------------------------------------------------------------
# Fused kernel: B images per grid step, everything stays in VMEM.
# ---------------------------------------------------------------------------
def _conv_sequence_kernel(x_ref, w1_ref, b1_ref, wr_ref, br_ref,
                          hneg_ref, m2_ref, sel_ref, o_ref,
                          pat1, pat2, extp, ext2, *, Cin_p, Cout, H, W, B):
    H2, W2 = (H + 1) // 2, (W + 1) // 2
    Wp1, Wp2 = W + 2, W2 + 2
    L1, L2 = (H + 2) * Wp1, (H2 + 2) * Wp2
    M1, M2 = Wp1 + 1, Wp2 + 1          # max |tap shift| == margin width
    BL1, BL2 = B * L1, B * L2

    def conv3x3(read, pat_ref, C, Wp, w2d, bias):
        # im2col: tap (kh,kw) == flat lane shift (kh-1)*Wp + (kw-1); zero padding
        # comes from the zero halos already present in the padded-flat layout.
        for kh in range(3):
            for kw in range(3):
                s = (kh - 1) * Wp + (kw - 1)
                pat_ref[pl.ds((kh * 3 + kw) * C, C), :] = read(s)
        # one K = 9*C MXU matmul over B*L lanes, bias broadcast over lanes
        return jnp.dot(w2d, pat_ref[...], preferred_element_type=jnp.float32) + bias

    # ---- per-step margin zeroing (tiny; interiors are fully overwritten) ----
    zp = jnp.zeros((Cout, M1), jnp.float32)
    extp[:, pl.ds(0, M1)] = zp
    extp[:, pl.ds(M1 + BL1, M1)] = zp
    z2 = jnp.zeros((Cout, M2), jnp.float32)
    ext2[:, pl.ds(0, M2)] = z2
    ext2[:, pl.ds(M2 + BL2, M2)] = z2

    # ---- stage 1: 3x3 conv, pad 1 (taps read straight off the input block) ----
    read1 = lambda s: x_ref[0, :, pl.ds(M1 + s, BL1)]
    y1 = conv3x3(read1, pat1, Cin_p, Wp1, w1_ref[...], b1_ref[...])     # (Cout, B*L1)

    # ---- stage 2: maxpool 3x3, stride 2, pad 1 ----
    yp = y1 + hneg_ref[...]                       # halo -> ~-1e30 ("-inf" padding)
    extp[:, pl.ds(M1, BL1)] = yp
    dense = yp
    for kh in range(3):
        for kw in range(3):
            if kh == 1 and kw == 1:
                continue
            s = (kh - 1) * Wp1 + (kw - 1)
            dense = jnp.maximum(dense, extp[:, pl.ds(M1 + s, BL1)])
    # stride-2 subsample straight into the pooled padded-flat layout (zero halo)
    x2 = jnp.dot(dense, sel_ref[...], preferred_element_type=jnp.float32)  # (Cout, B*L2)

    # ---- stages 3 & 4: residual blocks ----
    m2 = m2_ref[...]
    read2 = lambda s: ext2[:, pl.ds(M2 + s, BL2)]
    for blk in range(2):
        a = jnp.maximum(x2, 0.0)                  # relu (halo stays 0)
        ext2[:, pl.ds(M2, BL2)] = a
        z0 = conv3x3(read2, pat2, Cout, Wp2, wr_ref[2 * blk], br_ref[2 * blk])
        z0 = jnp.maximum(z0 * m2, 0.0)            # re-zero halo + relu
        ext2[:, pl.ds(M2, BL2)] = z0
        z1 = conv3x3(read2, pat2, Cout, Wp2, wr_ref[2 * blk + 1], br_ref[2 * blk + 1])
        x2 = (z1 + x2) * m2                       # residual add, zero halo

    # ---- one lane-dense output store (interior sliced out in the wrapper) ----
    o_ref[0, :, :] = x2


# ---------------------------------------------------------------------------
# Public wrapper: NCHW in / NCHW out, matching the PyTorch module.
# ---------------------------------------------------------------------------
def conv_sequence_forward(x_nchw, params, *, lane_target=512, vmem_budget=8 * 2**20):
    x = x_nchw.astype(jnp.float32)
    N, Cin, H, W = x.shape
    w_c, b_c = params["conv"]
    Cout = w_c.shape[-1]
    H2, W2 = (H + 1) // 2, (W + 1) // 2
    Wp1, Wp2 = W + 2, W2 + 2
    L1, L2 = (H + 2) * Wp1, (H2 + 2) * Wp2
    M1, M2 = Wp1 + 1, Wp2 + 1
    Cin_p = ((Cin + 7) // 8) * 8                  # sublane-align stage-1 tap blocks

    B = _choose_batch(N, Cin_p, Cout, L1, L2, M1, M2, lane_target, vmem_budget)
    G = N // B
    BL1, BL2 = B * L1, B * L2

    # ---- weights: (Cout, 9*C), tap-major / channel-minor, K zero-padded ----
    w1 = jnp.pad(w_c.astype(jnp.float32),
                 ((0, 0), (0, 0), (0, Cin_p - Cin), (0, 0))).reshape(9 * Cin_p, Cout).T
    b1 = b_c.reshape(Cout, 1).astype(jnp.float32)
    res_keys = ("res0_c0", "res0_c1", "res1_c0", "res1_c1")
    wr = jnp.stack([params[k][0].astype(jnp.float32).reshape(9 * Cout, Cout).T
                    for k in res_keys])                       # (4, Cout, 9*Cout)
    br = jnp.stack([params[k][1].astype(jnp.float32).reshape(Cout, 1)
                    for k in res_keys])                       # (4, Cout, 1)
    hneg, m2, sel = _build_constants(B, H, W)

    # ---- input: channel pad -> spatial halo -> padded-flat, B images per lane
    #      group, plus tap-shift margins.  One fused XLA pad/reshape/transpose.
    xp = jnp.pad(x, ((0, 0), (0, Cin_p - Cin), (1, 1), (1, 1)))   # (N, Cin_p, H+2, W+2)
    xp = xp.reshape(N, Cin_p, L1).reshape(G, B, Cin_p, L1)
    xp = xp.transpose(0, 2, 1, 3).reshape(G, Cin_p, BL1)
    xp = jnp.pad(xp, ((0, 0), (0, 0), (M1, M1)))                  # zero margins

    kernel = functools.partial(_conv_sequence_kernel,
                               Cin_p=Cin_p, Cout=Cout, H=H, W=W, B=B)

    vmem_est = _vmem_estimate(B, Cin_p, Cout, L1, L2, M1, M2)
    vmem_limit = int(min(64 * 2**20, max(32 * 2**20, 4 * vmem_est)))

    out = pl.pallas_call(
        kernel,
        out_shape=jax.ShapeDtypeStruct((G, Cout, BL2), jnp.float32),
        grid=(G,),
        in_specs=[
            pl.BlockSpec((1, Cin_p, 2 * M1 + BL1), lambda g: (g, 0, 0)),
            pl.BlockSpec((Cout, 9 * Cin_p), lambda g: (0, 0)),
            pl.BlockSpec((Cout, 1), lambda g: (0, 0)),
            pl.BlockSpec((4, Cout, 9 * Cout), lambda g: (0, 0, 0)),
            pl.BlockSpec((4, Cout, 1), lambda g: (0, 0, 0)),
            pl.BlockSpec((1, BL1), lambda g: (0, 0)),
            pl.BlockSpec((1, BL2), lambda g: (0, 0)),
            pl.BlockSpec((BL1, BL2), lambda g: (0, 0)),
        ],
        out_specs=pl.BlockSpec((1, Cout, BL2), lambda g: (g, 0, 0)),
        scratch_shapes=[
            pltpu.VMEM((9 * Cin_p, BL1), jnp.float32),        # pat1 (im2col, stage 1)
            pltpu.VMEM((9 * Cout, BL2), jnp.float32),         # pat2 (im2col, res blocks)
            pltpu.VMEM((Cout, 2 * M1 + BL1), jnp.float32),    # maxpool shift buffer
            pltpu.VMEM((Cout, 2 * M2 + BL2), jnp.float32),    # residual shift buffer
        ],
        compiler_params=pltpu.CompilerParams(
            dimension_semantics=("parallel",),
            vmem_limit_bytes=vmem_limit),
    )(xp, w1, b1, wr, br, hneg, m2, sel)

    # lane-dense padded-flat -> NCHW (pure XLA layout plumbing outside the kernel)
    out = out.reshape(G, Cout, B, H2 + 2, W2 + 2)[:, :, :, 1:H2 + 1, 1:W2 + 1]
    return out.transpose(0, 2, 1, 3, 4).reshape(N, Cout, H2, W2)


# ---------------------------------------------------------------------------
# Pure-JAX reference (correctness check only).
# ---------------------------------------------------------------------------
def _conv_ref(x, w, b):
    y = jax.lax.conv_general_dilated(
        x, w, window_strides=(1, 1), padding=((1, 1), (1, 1)),
        dimension_numbers=("NHWC", "HWIO", "NHWC"))
    return y + b


def _reference(x_nchw, params):
    x = jnp.transpose(x_nchw, (0, 2, 3, 1)).astype(jnp.float32)
    w, b = params["conv"]
    x = _conv_ref(x, w, b)
    x = jax.lax.reduce_window(
        x, -jnp.inf, jax.lax.max,
        window_dimensions=(1, 3, 3, 1), window_strides=(1, 2, 2, 1),
        padding=((0, 0), (1, 1), (1, 1), (0, 0)))
    for blk in ("res0", "res1"):
        w0, b0 = params[blk + "_c0"]
        w1, b1 = params[blk + "_c1"]
        h = _conv_ref(jnp.maximum(x, 0.0), w0, b0)
        x = _conv_ref(jnp.maximum(h, 0.0), w1, b1) + x
    return jnp.transpose(x, (0, 3, 1, 2))


if __name__ == "__main__":
    key = jax.random.PRNGKey(0)
    N, Cin, H, W = 4, 4, 16, 16       # input_shape = (4, 16, 16)
    Cout = 8                          # out_channels = 8
    keys = jax.random.split(key, 11)

    x_nchw = jax.random.normal(keys[0], (N, Cin, H, W), jnp.float32)

    def make_conv(kw_, kb_, cin, cout):
        w = 0.1 * jax.random.normal(kw_, (3, 3, cin, cout), jnp.float32)  # HWIO
        b = 0.05 * jax.random.normal(kb_, (cout,), jnp.float32)
        return w, b

    params = {
        "conv":    make_conv(keys[1], keys[2], Cin, Cout),
        "res0_c0": make_conv(keys[3], keys[4], Cout, Cout),
        "res0_c1": make_conv(keys[5], keys[6], Cout, Cout),
        "res1_c0": make_conv(keys[7], keys[8], Cout, Cout),
        "res1_c1": make_conv(keys[9], keys[10], Cout, Cout),
    }

    fwd = jax.jit(conv_sequence_forward)
    y = jax.block_until_ready(fwd(x_nchw, params))

    # shape contract of ConvSequence.get_output_shape()
    assert y.shape == (N, Cout, (H + 1) // 2, (W + 1) // 2), y.shape

    y_ref = jax.block_until_ready(_reference(x_nchw, params))
    assert jnp.allclose(y, y_ref, atol=1e-3, rtol=1e-3), (
        float(jnp.max(jnp.abs(y - y_ref))))

    print("KERNEL_OK")
</pallas_src>

<mosaic_0001>
module attributes {stable_mosaic.version = 11 : i64} {
  func.func @_conv_sequence_kernel(%arg0: i32, %arg1: memref<1x8x686xf32, #tpu.memory_space<vmem>>, %arg2: memref<8x72xf32, #tpu.memory_space<vmem>>, %arg3: memref<8x1xf32, #tpu.memory_space<vmem>>, %arg4: memref<4x8x72xf32, #tpu.memory_space<vmem>>, %arg5: memref<4x8x1xf32, #tpu.memory_space<vmem>>, %arg6: memref<1x648xf32, #tpu.memory_space<vmem>>, %arg7: memref<1x200xf32, #tpu.memory_space<vmem>>, %arg8: memref<648x200xf32, #tpu.memory_space<vmem>>, %arg9: memref<1x8x200xf32, #tpu.memory_space<vmem>>, %arg10: memref<72x648xf32, #tpu.memory_space<vmem>>, %arg11: memref<72x200xf32, #tpu.memory_space<vmem>>, %arg12: memref<8x686xf32, #tpu.memory_space<vmem>>, %arg13: memref<8x222xf32, #tpu.memory_space<vmem>>) attributes {dimension_semantics = [#tpu.dimension_semantics<parallel>], iteration_bounds = array<i64: 2>, scalar_prefetch = 0 : i64, scratch_operands = 4 : i64, tpu.core_type = #tpu.core_type<tc>, window_params = [{transform_indices = @transform_0, window_bounds = array<i64: 1, 8, 686>}, {pipeline_mode = #tpu.pipeline_mode<synchronous>, transform_indices = @transform_1, window_bounds = array<i64: 8, 72>}, {pipeline_mode = #tpu.pipeline_mode<synchronous>, transform_indices = @transform_2, window_bounds = array<i64: 8, 1>}, {pipeline_mode = #tpu.pipeline_mode<synchronous>, transform_indices = @transform_3, window_bounds = array<i64: 4, 8, 72>}, {pipeline_mode = #tpu.pipeline_mode<synchronous>, transform_indices = @transform_4, window_bounds = array<i64: 4, 8, 1>}, {pipeline_mode = #tpu.pipeline_mode<synchronous>, transform_indices = @transform_5, window_bounds = array<i64: 1, 648>}, {pipeline_mode = #tpu.pipeline_mode<synchronous>, transform_indices = @transform_6, window_bounds = array<i64: 1, 200>}, {pipeline_mode = #tpu.pipeline_mode<synchronous>, transform_indices = @transform_7, window_bounds = array<i64: 648, 200>}, {transform_indices = @transform_8, window_bounds = array<i64: 1, 8, 200>}]} {
    %cst = arith.constant 0.000000e+00 : f32
    %0 = vector.broadcast %cst : f32 to vector<8x19xf32>
    %c0 = arith.constant 0 : index
    %c0_0 = arith.constant 0 : index
    %1 = vector.load %arg12[%c0, %c0_0] : memref<8x686xf32, #tpu.memory_space<vmem>>, vector<8x19xf32>
    tpu.vector_store %arg12[%c0, %c0_0], %0 {strides = array<i32>} : memref<8x686xf32, #tpu.memory_space<vmem>>, vector<8x19xf32>,
    %c0_1 = arith.constant 0 : index
    %c667 = arith.constant 667 : index
    %2 = vector.load %arg12[%c0_1, %c667] : memref<8x686xf32, #tpu.memory_space<vmem>>, vector<8x19xf32>
    tpu.vector_store %arg12[%c0_1, %c667], %0 {strides = array<i32>} : memref<8x686xf32, #tpu.memory_space<vmem>>, vector<8x19xf32>,
    %cst_2 = arith.constant 0.000000e+00 : f32
    %3 = vector.broadcast %cst_2 : f32 to vector<8x11xf32>
    %c0_3 = arith.constant 0 : index
    %c0_4 = arith.constant 0 : index
    %4 = vector.load %arg13[%c0_3, %c0_4] : memref<8x222xf32, #tpu.memory_space<vmem>>, vector<8x11xf32>
    tpu.vector_store %arg13[%c0_3, %c0_4], %3 {strides = array<i32>} : memref<8x222xf32, #tpu.memory_space<vmem>>, vector<8x11xf32>,
    %c0_5 = arith.constant 0 : index
    %c211 = arith.constant 211 : index
    %5 = vector.load %arg13[%c0_5, %c211] : memref<8x222xf32, #tpu.memory_space<vmem>>, vector<8x11xf32>
    tpu.vector_store %arg13[%c0_5, %c211], %3 {strides = array<i32>} : memref<8x222xf32, #tpu.memory_space<vmem>>, vector<8x11xf32>,
    %c0_6 = arith.constant 0 : index
    %c0_7 = arith.constant 0 : index
    %6 = vector.load %arg2[%c0_6, %c0_7] : memref<8x72xf32, #tpu.memory_space<vmem>>, vector<8x72xf32>
    %c0_8 = arith.constant 0 : index
    %c0_9 = arith.constant 0 : index
    %7 = vector.load %arg3[%c0_8, %c0_9] : memref<8x1xf32, #tpu.memory_space<vmem>>, vector<8x1xf32>
    %c0_10 = arith.constant 0 : index
    %c0_11 = arith.constant 0 : index
    %c0_12 = arith.constant 0 : index
    %8 = vector.load %arg1[%c0_10, %c0_11, %c0_12] : memref<1x8x686xf32, #tpu.memory_space<vmem>>, vector<1x8x648xf32>
    %9 = vector.shape_cast %8 : vector<1x8x648xf32> to vector<8x648xf32>
    %c0_13 = arith.constant 0 : index
    %c0_14 = arith.constant 0 : index
    %10 = vector.load %arg10[%c0_13, %c0_14] : memref<72x648xf32, #tpu.memory_space<vmem>>, vector<8x648xf32>
    tpu.vector_store %arg10[%c0_13, %c0_14], %9 {strides = array<i32>} : memref<72x648xf32, #tpu.memory_space<vmem>>, vector<8x648xf32>,
    %c0_15 = arith.constant 0 : index
    %c0_16 = arith.constant 0 : index
    %c1 = arith.constant 1 : index
    %11 = vector.load %arg1[%c0_15, %c0_16, %c1] : memref<1x8x686xf32, #tpu.memory_space<vmem>>, vector<1x8x648xf32>
    %12 = vector.shape_cast %11 : vector<1x8x648xf32> to vector<8x648xf32>
    %c8 = arith.constant 8 : index
    %c0_17 = arith.constant 0 : index
    %13 = vector.load %arg10[%c8, %c0_17] : memref<72x648xf32, #tpu.memory_space<vmem>>, vector<8x648xf32>
    tpu.vector_store %arg10[%c8, %c0_17], %12 {strides = array<i32>} : memref<72x648xf32, #tpu.memory_space<vmem>>, vector<8x648xf32>,
    %c0_18 = arith.constant 0 : index
    %c0_19 = arith.constant 0 : index
    %c2 = arith.constant 2 : index
    %14 = vector.load %arg1[%c0_18, %c0_19, %c2] : memref<1x8x686xf32, #tpu.memory_space<vmem>>, vector<1x8x648xf32>
    %15 = vector.shape_cast %14 : vector<1x8x648xf32> to vector<8x648xf32>
    %c16 = arith.constant 16 : index
    %c0_20 = arith.constant 0 : index
    %16 = vector.load %arg10[%c16, %c0_20] : memref<72x648xf32, #tpu.memory_space<vmem>>, vector<8x648xf32>
    tpu.vector_store %arg10[%c16, %c0_20], %15 {strides = array<i32>} : memref<72x648xf32, #tpu.memory_space<vmem>>, vector<8x648xf32>,
    %c0_21 = arith.constant 0 : index
    %c0_22 = arith.constant 0 : index
    %c18 = arith.constant 18 : index
    %17 = vector.load %arg1[%c0_21, %c0_22, %c18] : memref<1x8x686xf32, #tpu.memory_space<vmem>>, vector<1x8x648xf32>
    %18 = vector.shape_cast %17 : vector<1x8x648xf32> to vector<8x648xf32>
    %c24 = arith.constant 24 : index
    %c0_23 = arith.constant 0 : index
    %19 = vector.load %arg10[%c24, %c0_23] : memref<72x648xf32, #tpu.memory_space<vmem>>, vector<8x648xf32>
    tpu.vector_store %arg10[%c24, %c0_23], %18 {strides = array<i32>} : memref<72x648xf32, #tpu.memory_space<vmem>>, vector<8x648xf32>,
    %c0_24 = arith.constant 0 : index
    %c0_25 = arith.constant 0 : index
    %c19 = arith.constant 19 : index
    %20 = vector.load %arg1[%c0_24, %c0_25, %c19] : memref<1x8x686xf32, #tpu.memory_space<vmem>>, vector<1x8x648xf32>
    %21 = vector.shape_cast %20 : vector<1x8x648xf32> to vector<8x648xf32>
    %c32 = arith.constant 32 : index
    %c0_26 = arith.constant 0 : index
    %22 = vector.load %arg10[%c32, %c0_26] : memref<72x648xf32, #tpu.memory_space<vmem>>, vector<8x648xf32>
    tpu.vector_store %arg10[%c32, %c0_26], %21 {strides = array<i32>} : memref<72x648xf32, #tpu.memory_space<vmem>>, vector<8x648xf32>,
    %c0_27 = arith.constant 0 : index
    %c0_28 = arith.constant 0 : index
    %c20 = arith.constant 20 : index
    %23 = vector.load %arg1[%c0_27, %c0_28, %c20] : memref<1x8x686xf32, #tpu.memory_space<vmem>>, vector<1x8x648xf32>
    %24 = vector.shape_cast %23 : vector<1x8x648xf32> to vector<8x648xf32>
    %c40 = arith.constant 40 : index
    %c0_29 = arith.constant 0 : index
    %25 = vector.load %arg10[%c40, %c0_29] : memref<72x648xf32, #tpu.memory_space<vmem>>, vector<8x648xf32>
    tpu.vector_store %arg10[%c40, %c0_29], %24 {strides = array<i32>} : memref<72x648xf32, #tpu.memory_space<vmem>>, vector<8x648xf32>,
    %c0_30 = arith.constant 0 : index
    %c0_31 = arith.constant 0 : index
    %c36 = arith.constant 36 : index
    %26 = vector.load %arg1[%c0_30, %c0_31, %c36] : memref<1x8x686xf32, #tpu.memory_space<vmem>>, vector<1x8x648xf32>
    %27 = vector.shape_cast %26 : vector<1x8x648xf32> to vector<8x648xf32>
    %c48 = arith.constant 48 : index
    %c0_32 = arith.constant 0 : index
    %28 = vector.load %arg10[%c48, %c0_32] : memref<72x648xf32, #tpu.memory_space<vmem>>, vector<8x648xf32>
    tpu.vector_store %arg10[%c48, %c0_32], %27 {strides = array<i32>} : memref<72x648xf32, #tpu.memory_space<vmem>>, vector<8x648xf32>,
    %c0_33 = arith.constant 0 : index
    %c0_34 = arith.constant 0 : index
    %c37 = arith.constant 37 : index
    %29 = vector.load %arg1[%c0_33, %c0_34, %c37] : memref<1x8x686xf32, #tpu.memory_space<vmem>>, vector<1x8x648xf32>
    %30 = vector.shape_cast %29 : vector<1x8x648xf32> to vector<8x648xf32>
    %c56 = arith.constant 56 : index
    %c0_35 = arith.constant 0 : index
    %31 = vector.load %arg10[%c56, %c0_35] : memref<72x648xf32, #tpu.memory_space<vmem>>, vector<8x648xf32>
    tpu.vector_store %arg10[%c56, %c0_35], %30 {strides = array<i32>} : memref<72x648xf32, #tpu.memory_space<vmem>>, vector<8x648xf32>,
    %c0_36 = arith.constant 0 : index
    %c0_37 = arith.constant 0 : index
    %c38 = arith.constant 38 : index
    %32 = vector.load %arg1[%c0_36, %c0_37, %c38] : memref<1x8x686xf32, #tpu.memory_space<vmem>>, vector<1x8x648xf32>
    %33 = vector.shape_cast %32 : vector<1x8x648xf32> to vector<8x648xf32>
    %c64 = arith.constant 64 : index
    %c0_38 = arith.constant 0 : index
    %34 = vector.load %arg10[%c64, %c0_38] : memref<72x648xf32, #tpu.memory_space<vmem>>, vector<8x648xf32>
    tpu.vector_store %arg10[%c64, %c0_38], %33 {strides = array<i32>} : memref<72x648xf32, #tpu.memory_space<vmem>>, vector<8x648xf32>,
    %c0_39 = arith.constant 0 : index
    %c0_40 = arith.constant 0 : index
    %35 = vector.load %arg10[%c0_39, %c0_40] : memref<72x648xf32, #tpu.memory_space<vmem>>, vector<72x648xf32>
    %cst_41 = arith.constant dense<0.000000e+00> : vector<8x648xf32>
    %36 = tpu.matmul %6, %35, %cst_41 {dimension_numbers = #tpu.dot_dimension_numbers<[1], [0], [0], [1], [0, 0, 1, 1], [], []>} : vector<8x72xf32>, vector<72x648xf32>, vector<8x648xf32> -> vector<8x648xf32>
    %37 = vector.broadcast %7 : vector<8x1xf32> to vector<8x648xf32>
    %38 = arith.addf %36, %37 : vector<8x648xf32>
    %c0_42 = arith.constant 0 : index
    %c0_43 = arith.constant 0 : index
    %39 = vector.load %arg6[%c0_42, %c0_43] : memref<1x648xf32, #tpu.memory_space<vmem>>, vector<1x648xf32>
    %40 = vector.broadcast %39 : vector<1x648xf32> to vector<8x648xf32>
    %41 = arith.addf %38, %40 : vector<8x648xf32>
    %c0_44 = arith.constant 0 : index
    %c19_45 = arith.constant 19 : index
    %42 = vector.load %arg12[%c0_44, %c19_45] : memref<8x686xf32, #tpu.memory_space<vmem>>, vector<8x648xf32>
    tpu.vector_store %arg12[%c0_44, %c19_45], %41 {strides = array<i32>} : memref<8x686xf32, #tpu.memory_space<vmem>>, vector<8x648xf32>,
    %c0_46 = arith.constant 0 : index
    %c0_47 = arith.constant 0 : index
    %43 = vector.load %arg12[%c0_46, %c0_47] : memref<8x686xf32, #tpu.memory_space<vmem>>, vector<8x648xf32>
    %44 = arith.maximumf %41, %43 : vector<8x648xf32>
    %c0_48 = arith.constant 0 : index
    %c1_49 = arith.constant 1 : index
    %45 = vector.load %arg12[%c0_48, %c1_49] : memref<8x686xf32, #tpu.memory_space<vmem>>, vector<8x648xf32>
    %46 = arith.maximumf %44, %45 : vector<8x648xf32>
    %c0_50 = arith.constant 0 : index
    %c2_51 = arith.constant 2 : index
    %47 = vector.load %arg12[%c0_50, %c2_51] : memref<8x686xf32, #tpu.memory_space<vmem>>, vector<8x648xf32>
    %48 = arith.maximumf %46, %47 : vector<8x648xf32>
    %c0_52 = arith.constant 0 : index
    %c18_53 = arith.constant 18 : index
    %49 = vector.load %arg12[%c0_52, %c18_53] : memref<8x686xf32, #tpu.memory_space<vmem>>, vector<8x648xf32>
    %50 = arith.maximumf %48, %49 : vector<8x648xf32>
    %c0_54 = arith.constant 0 : index
    %c20_55 = arith.constant 20 : index
    %51 = vector.load %arg12[%c0_54, %c20_55] : memref<8x686xf32, #tpu.memory_space<vmem>>, vector<8x648xf32>
    %52 = arith.maximumf %50, %51 : vector<8x648xf32>
    %c0_56 = arith.constant 0 : index
    %c36_57 = arith.constant 36 : index
    %53 = vector.load %arg12[%c0_56, %c36_57] : memref<8x686xf32, #tpu.memory_space<vmem>>, vector<8x648xf32>
    %54 = arith.maximumf %52, %53 : vector<8x648xf32>
    %c0_58 = arith.constant 0 : index
    %c37_59 = arith.constant 37 : index
    %55 = vector.load %arg12[%c0_58, %c37_59] : memref<8x686xf32, #tpu.memory_space<vmem>>, vector<8x648xf32>
    %56 = arith.maximumf %54, %55 : vector<8x648xf32>
    %c0_60 = arith.constant 0 : index
    %c38_61 = arith.constant 38 : index
    %57 = vector.load %arg12[%c0_60, %c38_61] : memref<8x686xf32, #tpu.memory_space<vmem>>, vector<8x648xf32>
    %58 = arith.maximumf %56, %57 : vector<8x648xf32>
    %c0_62 = arith.constant 0 : index
    %c0_63 = arith.constant 0 : index
    %59 = vector.load %arg8[%c0_62, %c0_63] : memref<648x200xf32, #tpu.memory_space<vmem>>, vector<648x200xf32>
    %cst_64 = arith.constant dense<0.000000e+00> : vector<8x200xf32>
    %60 = tpu.matmul %58, %59, %cst_64 {dimension_numbers = #tpu.dot_dimension_numbers<[1], [0], [0], [1], [0, 0, 1, 1], [], []>} : vector<8x648xf32>, vector<648x200xf32>, vector<8x200xf32> -> vector<8x200xf32>
    %c0_65 = arith.constant 0 : index
    %c0_66 = arith.constant 0 : index
    %61 = vector.load %arg7[%c0_65, %c0_66] : memref<1x200xf32, #tpu.memory_space<vmem>>, vector<1x200xf32>
    %cst_67 = arith.constant 0.000000e+00 : f32
    %62 = vector.broadcast %cst_67 : f32 to vector<8x200xf32>
    %63 = arith.maximumf %60, %62 : vector<8x200xf32>
    %c0_68 = arith.constant 0 : index
    %c11 = arith.constant 11 : index
    %64 = vector.load %arg13[%c0_68, %c11] : memref<8x222xf32, #tpu.memory_space<vmem>>, vector<8x200xf32>
    tpu.vector_store %arg13[%c0_68, %c11], %63 {strides = array<i32>} : memref<8x222xf32, #tpu.memory_space<vmem>>, vector<8x200xf32>,
    %c0_69 = arith.constant 0 : index
    %c0_70 = arith.constant 0 : index
    %c0_71 = arith.constant 0 : index
    %65 = vector.load %arg4[%c0_69, %c0_70, %c0_71] : memref<4x8x72xf32, #tpu.memory_space<vmem>>, vector<1x8x72xf32>
    %66 = vector.shape_cast %65 : vector<1x8x72xf32> to vector<8x72xf32>
    %c0_72 = arith.constant 0 : index
    %c0_73 = arith.constant 0 : index
    %c0_74 = arith.constant 0 : index
    %67 = vector.load %arg5[%c0_72, %c0_73, %c0_74] : memref<4x8x1xf32, #tpu.memory_space<vmem>>, vector<1x8x1xf32>
    %68 = vector.shape_cast %67 : vector<1x8x1xf32> to vector<8x1xf32>
    %c0_75 = arith.constant 0 : index
    %c0_76 = arith.constant 0 : index
    %69 = vector.load %arg13[%c0_75, %c0_76] : memref<8x222xf32, #tpu.memory_space<vmem>>, vector<8x200xf32>
    %c0_77 = arith.constant 0 : index
    %c0_78 = arith.constant 0 : index
    %70 = vector.load %arg11[%c0_77, %c0_78] : memref<72x200xf32, #tpu.memory_space<vmem>>, vector<8x200xf32>
    tpu.vector_store %arg11[%c0_77, %c0_78], %69 {strides = array<i32>} : memref<72x200xf32, #tpu.memory_space<vmem>>, vector<8x200xf32>,
    %c0_79 = arith.constant 0 : index
    %c1_80 = arith.constant 1 : index
    %71 = vector.load %arg13[%c0_79, %c1_80] : memref<8x222xf32, #tpu.memory_space<vmem>>, vector<8x200xf32>
    %c8_81 = arith.constant 8 : index
    %c0_82 = arith.constant 0 : index
    %72 = vector.load %arg11[%c8_81, %c0_82] : memref<72x200xf32, #tpu.memory_space<vmem>>, vector<8x200xf32>
    tpu.vector_store %arg11[%c8_81, %c0_82], %71 {strides = array<i32>} : memref<72x200xf32, #tpu.memory_space<vmem>>, vector<8x200xf32>,
    %c0_83 = arith.constant 0 : index
    %c2_84 = arith.constant 2 : index
    %73 = vector.load %arg13[%c0_83, %c2_84] : memref<8x222xf32, #tpu.memory_space<vmem>>, vector<8x200xf32>
    %c16_85 = arith.constant 16 : index
    %c0_86 = arith.constant 0 : index
    %74 = vector.load %arg11[%c16_85, %c0_86] : memref<72x200xf32, #tpu.memory_space<vmem>>, vector<8x200xf32>
    tpu.vector_store %arg11[%c16_85, %c0_86], %73 {strides = array<i32>} : memref<72x200xf32, #tpu.memory_space<vmem>>, vector<8x200xf32>,
    %c0_87 = arith.constant 0 : index
    %c10 = arith.constant 10 : index
    %75 = vector.load %arg13[%c0_87, %c10] : memref<8x222xf32, #tpu.memory_space<vmem>>, vector<8x200xf32>
    %c24_88 = arith.constant 24 : index
    %c0_89 = arith.constant 0 : index
    %76 = vector.load %arg11[%c24_88, %c0_89] : memref<72x200xf32, #tpu.memory_space<vmem>>, vector<8x200xf32>
    tpu.vector_store %arg11[%c24_88, %c0_89], %75 {strides = array<i32>} : memref<72x200xf32, #tpu.memory_space<vmem>>, vector<8x200xf32>,
    %c0_90 = arith.constant 0 : index
    %c11_91 = arith.constant 11 : index
    %77 = vector.load %arg13[%c0_90, %c11_91] : memref<8x222xf32, #tpu.memory_space<vmem>>, vector<8x200xf32>
    %c32_92 = arith.constant 32 : index
    %c0_93 = arith.constant 0 : index
    %78 = vector.load %arg11[%c32_92, %c0_93] : memref<72x200xf32, #tpu.memory_space<vmem>>, vector<8x200xf32>
    tpu.vector_store %arg11[%c32_92, %c0_93], %77 {strides = array<i32>} : memref<72x200xf32, #tpu.memory_space<vmem>>, vector<8x200xf32>,
    %c0_94 = arith.constant 0 : index
    %c12 = arith.constant 12 : index
    %79 = vector.load %arg13[%c0_94, %c12] : memref<8x222xf32, #tpu.memory_space<vmem>>, vector<8x200xf32>
    %c40_95 = arith.constant 40 : index
    %c0_96 = arith.constant 0 : index
    %80 = vector.load %arg11[%c40_95, %c0_96] : memref<72x200xf32, #tpu.memory_space<vmem>>, vector<8x200xf32>
    tpu.vector_store %arg11[%c40_95, %c0_96], %79 {strides = array<i32>} : memref<72x200xf32, #tpu.memory_space<vmem>>, vector<8x200xf32>,
    %c0_97 = arith.constant 0 : index
    %c20_98 = arith.constant 20 : index
    %81 = vector.load %arg13[%c0_97, %c20_98] : memref<8x222xf32, #tpu.memory_space<vmem>>, vector<8x200xf32>
    %c48_99 = arith.constant 48 : index
    %c0_100 = arith.constant 0 : index
    %82 = vector.load %arg11[%c48_99, %c0_100] : memref<72x200xf32, #tpu.memory_space<vmem>>, vector<8x200xf32>
    tpu.vector_store %arg11[%c48_99, %c0_100], %81 {strides = array<i32>} : memref<72x200xf32, #tpu.memory_space<vmem>>, vector<8x200xf32>,
    %c0_101 = arith.constant 0 : index
    %c21 = arith.constant 21 : index
    %83 = vector.load %arg13[%c0_101, %c21] : memref<8x222xf32, #tpu.memory_space<vmem>>, vector<8x200xf32>
    %c56_102 = arith.constant 56 : index
    %c0_103 = arith.constant 0 : index
    %84 = vector.load %arg11[%c56_102, %c0_103] : memref<72x200xf32, #tpu.memory_space<vmem>>, vector<8x200xf32>
    tpu.vector_store %arg11[%c56_102, %c0_103], %83 {strides = array<i32>} : memref<72x200xf32, #tpu.memory_space<vmem>>, vector<8x200xf32>,
    %c0_104 = arith.constant 0 : index
    %c22 = arith.constant 22 : index
    %85 = vector.load %arg13[%c0_104, %c22] : memref<8x222xf32, #tpu.memory_space<vmem>>, vector<8x200xf32>
    %c64_105 = arith.constant 64 : index
    %c0_106 = arith.constant 0 : index
    %86 = vector.load %arg11[%c64_105, %c0_106] : memref<72x200xf32, #tpu.memory_space<vmem>>, vector<8x200xf32>
    tpu.vector_store %arg11[%c64_105, %c0_106], %85 {strides = array<i32>} : memref<72x200xf32, #tpu.memory_space<vmem>>, vector<8x200xf32>,
    %c0_107 = arith.constant 0 : index
    %c0_108 = arith.constant 0 : index
    %87 = vector.load %arg11[%c0_107, %c0_108] : memref<72x200xf32, #tpu.memory_space<vmem>>, vector<72x200xf32>
    %cst_109 = arith.constant dense<0.000000e+00> : vector<8x200xf32>
    %88 = tpu.matmul %66, %87, %cst_109 {dimension_numbers = #tpu.dot_dimension_numbers<[1], [0], [0], [1], [0, 0, 1, 1], [], []>} : vector<8x72xf32>, vector<72x200xf32>, vector<8x200xf32> -> vector<8x200xf32>
    %89 = vector.broadcast %68 : vector<8x1xf32> to vector<8x200xf32>
    %90 = arith.addf %88, %89 : vector<8x200xf32>
    %91 = vector.broadcast %61 : vector<1x200xf32> to vector<8x200xf32>
    %92 = arith.mulf %90, %91 : vector<8x200xf32>
    %cst_110 = arith.constant 0.000000e+00 : f32
    %93 = vector.broadcast %cst_110 : f32 to vector<8x200xf32>
    %94 = arith.maximumf %92, %93 : vector<8x200xf32>
    %c0_111 = arith.constant 0 : index
    %c11_112 = arith.constant 11 : index
    %95 = vector.load %arg13[%c0_111, %c11_112] : memref<8x222xf32, #tpu.memory_space<vmem>>, vector<8x200xf32>
    tpu.vector_store %arg13[%c0_111, %c11_112], %94 {strides = array<i32>} : memref<8x222xf32, #tpu.memory_space<vmem>>, vector<8x200xf32>,
    %c1_113 = arith.constant 1 : index
    %c0_114 = arith.constant 0 : index
    %c0_115 = arith.constant 0 : index
    %96 = vector.load %arg4[%c1_113, %c0_114, %c0_115] : memref<4x8x72xf32, #tpu.memory_space<vmem>>, vector<1x8x72xf32>
    %97 = vector.shape_cast %96 : vector<1x8x72xf32> to vector<8x72xf32>
    %c1_116 = arith.constant 1 : index
    %c0_117 = arith.constant 0 : index
    %c0_118 = arith.constant 0 : index
    %98 = vector.load %arg5[%c1_116, %c0_117, %c0_118] : memref<4x8x1xf32, #tpu.memory_space<vmem>>, vector<1x8x1xf32>
    %99 = vector.shape_cast %98 : vector<1x8x1xf32> to vector<8x1xf32>
    %c0_119 = arith.constant 0 : index
    %c0_120 = arith.constant 0 : index
    %100 = vector.load %arg13[%c0_119, %c0_120] : memref<8x222xf32, #tpu.memory_space<vmem>>, vector<8x200xf32>
    %c0_121 = arith.constant 0 : index
    %c0_122 = arith.constant 0 : index
    %101 = vector.load %arg11[%c0_121, %c0_122] : memref<72x200xf32, #tpu.memory_space<vmem>>, vector<8x200xf32>
    tpu.vector_store %arg11[%c0_121, %c0_122], %100 {strides = array<i32>} : memref<72x200xf32, #tpu.memory_space<vmem>>, vector<8x200xf32>,
    %c0_123 = arith.constant 0 : index
    %c1_124 = arith.constant 1 : index
    %102 = vector.load %arg13[%c0_123, %c1_124] : memref<8x222xf32, #tpu.memory_space<vmem>>, vector<8x200xf32>
    %c8_125 = arith.constant 8 : index
    %c0_126 = arith.constant 0 : index
    %103 = vector.load %arg11[%c8_125, %c0_126] : memref<72x200xf32, #tpu.memory_space<vmem>>, vector<8x200xf32>
    tpu.vector_store %arg11[%c8_125, %c0_126], %102 {strides = array<i32>} : memref<72x200xf32, #tpu.memory_space<vmem>>, vector<8x200xf32>,
    %c0_127 = arith.constant 0 : index
    %c2_128 = arith.constant 2 : index
    %104 = vector.load %arg13[%c0_127, %c2_128] : memref<8x222xf32, #tpu.memory_space<vmem>>, vector<8x200xf32>
    %c16_129 = arith.constant 16 : index
    %c0_130 = arith.constant 0 : index
    %105 = vector.load %arg11[%c16_129, %c0_130] : memref<72x200xf32, #tpu.memory_space<vmem>>, vector<8x200xf32>
    tpu.vector_store %arg11[%c16_129, %c0_130], %104 {strides = array<i32>} : memref<72x200xf32, #tpu.memory_space<vmem>>, vector<8x200xf32>,
    %c0_131 = arith.constant 0 : index
    %c10_132 = arith.constant 10 : index
    %106 = vector.load %arg13[%c0_131, %c10_132] : memref<8x222xf32, #tpu.memory_space<vmem>>, vector<8x200xf32>
    %c24_133 = arith.constant 24 : index
    %c0_134 = arith.constant 0 : index
    %107 = vector.load %arg11[%c24_133, %c0_134] : memref<72x200xf32, #tpu.memory_space<vmem>>, vector<8x200xf32>
    tpu.vector_store %arg11[%c24_133, %c0_134], %106 {strides = array<i32>} : memref<72x200xf32, #tpu.memory_space<vmem>>, vector<8x200xf32>,
    %c0_135 = arith.constant 0 : index
    %c11_136 = arith.constant 11 : index
    %108 = vector.load %arg13[%c0_135, %c11_136] : memref<8x222xf32, #tpu.memory_space<vmem>>, vector<8x200xf32>
    %c32_137 = arith.constant 32 : index
    %c0_138 = arith.constant 0 : index
    %109 = vector.load %arg11[%c32_137, %c0_138] : memref<72x200xf32, #tpu.memory_space<vmem>>, vector<8x200xf32>
    tpu.vector_store %arg11[%c32_137, %c0_138], %108 {strides = array<i32>} : memref<72x200xf32, #tpu.memory_space<vmem>>, vector<8x200xf32>,
    %c0_139 = arith.constant 0 : index
    %c12_140 = arith.constant 12 : index
    %110 = vector.load %arg13[%c0_139, %c12_140] : memref<8x222xf32, #tpu.memory_space<vmem>>, vector<8x200xf32>
    %c40_141 = arith.constant 40 : index
    %c0_142 = arith.constant 0 : index
    %111 = vector.load %arg11[%c40_141, %c0_142] : memref<72x200xf32, #tpu.memory_space<vmem>>, vector<8x200xf32>
    tpu.vector_store %arg11[%c40_141, %c0_142], %110 {strides = array<i32>} : memref<72x200xf32, #tpu.memory_space<vmem>>, vector<8x200xf32>,
    %c0_143 = arith.constant 0 : index
    %c20_144 = arith.constant 20 : index
    %112 = vector.load %arg13[%c0_143, %c20_144] : memref<8x222xf32, #tpu.memory_space<vmem>>, vector<8x200xf32>
    %c48_145 = arith.constant 48 : index
    %c0_146 = arith.constant 0 : index
    %113 = vector.load %arg11[%c48_145, %c0_146] : memref<72x200xf32, #tpu.memory_space<vmem>>, vector<8x200xf32>
    tpu.vector_store %arg11[%c48_145, %c0_146], %112 {strides = array<i32>} : memref<72x200xf32, #tpu.memory_space<vmem>>, vector<8x200xf32>,
    %c0_147 = arith.constant 0 : index
    %c21_148 = arith.constant 21 : index
    %114 = vector.load %arg13[%c0_147, %c21_148] : memref<8x222xf32, #tpu.memory_space<vmem>>, vector<8x200xf32>
    %c56_149 = arith.constant 56 : index
    %c0_150 = arith.constant 0 : index
    %115 = vector.load %arg11[%c56_149, %c0_150] : memref<72x200xf32, #tpu.memory_space<vmem>>, vector<8x200xf32>
    tpu.vector_store %arg11[%c56_149, %c0_150], %114 {strides = array<i32>} : memref<72x200xf32, #tpu.memory_space<vmem>>, vector<8x200xf32>,
    %c0_151 = arith.constant 0 : index
    %c22_152 = arith.constant 22 : index
    %116 = vector.load %arg13[%c0_151, %c22_152] : memref<8x222xf32, #tpu.memory_space<vmem>>, vector<8x200xf32>
    %c64_153 = arith.constant 64 : index
    %c0_154 = arith.constant 0 : index
    %117 = vector.load %arg11[%c64_153, %c0_154] : memref<72x200xf32, #tpu.memory_space<vmem>>, vector<8x200xf32>
    tpu.vector_store %arg11[%c64_153, %c0_154], %116 {strides = array<i32>} : memref<72x200xf32, #tpu.memory_space<vmem>>, vector<8x200xf32>,
    %c0_155 = arith.constant 0 : index
    %c0_156 = arith.constant 0 : index
    %118 = vector.load %arg11[%c0_155, %c0_156] : memref<72x200xf32, #tpu.memory_space<vmem>>, vector<72x200xf32>
    %cst_157 = arith.constant dense<0.000000e+00> : vector<8x200xf32>
    %119 = tpu.matmul %97, %118, %cst_157 {dimension_numbers = #tpu.dot_dimension_numbers<[1], [0], [0], [1], [0, 0, 1, 1], [], []>} : vector<8x72xf32>, vector<72x200xf32>, vector<8x200xf32> -> vector<8x200xf32>
    %120 = vector.broadcast %99 : vector<8x1xf32> to vector<8x200xf32>
    %121 = arith.addf %119, %120 : vector<8x200xf32>
    %122 = arith.addf %121, %60 : vector<8x200xf32>
    %123 = vector.broadcast %61 : vector<1x200xf32> to vector<8x200xf32>
    %124 = arith.mulf %122, %123 : vector<8x200xf32>
    %cst_158 = arith.constant 0.000000e+00 : f32
    %125 = vector.broadcast %cst_158 : f32 to vector<8x200xf32>
    %126 = arith.maximumf %124, %125 : vector<8x200xf32>
    %c0_159 = arith.constant 0 : index
    %c11_160 = arith.constant 11 : index
    %127 = vector.load %arg13[%c0_159, %c11_160] : memref<8x222xf32, #tpu.memory_space<vmem>>, vector<8x200xf32>
    tpu.vector_store %arg13[%c0_159, %c11_160], %126 {strides = array<i32>} : memref<8x222xf32, #tpu.memory_space<vmem>>, vector<8x200xf32>,
    %c2_161 = arith.constant 2 : index
    %c0_162 = arith.constant 0 : index
    %c0_163 = arith.constant 0 : index
    %128 = vector.load %arg4[%c2_161, %c0_162, %c0_163] : memref<4x8x72xf32, #tpu.memory_space<vmem>>, vector<1x8x72xf32>
    %129 = vector.shape_cast %128 : vector<1x8x72xf32> to vector<8x72xf32>
    %c2_164 = arith.constant 2 : index
    %c0_165 = arith.constant 0 : index
    %c0_166 = arith.constant 0 : index
    %130 = vector.load %arg5[%c2_164, %c0_165, %c0_166] : memref<4x8x1xf32, #tpu.memory_space<vmem>>, vector<1x8x1xf32>
    %131 = vector.shape_cast %130 : vector<1x8x1xf32> to vector<8x1xf32>
    %c0_167 = arith.constant 0 : index
    %c0_168 = arith.constant 0 : index
    %132 = vector.load %arg13[%c0_167, %c0_168] : memref<8x222xf32, #tpu.memory_space<vmem>>, vector<8x200xf32>
    %c0_169 = arith.constant 0 : index
    %c0_170 = arith.constant 0 : index
    %133 = vector.load %arg11[%c0_169, %c0_170] : memref<72x200xf32, #tpu.memory_space<vmem>>, vector<8x200xf32>
    tpu.vector_store %arg11[%c0_169, %c0_170], %132 {strides = array<i32>} : memref<72x200xf32, #tpu.memory_space<vmem>>, vector<8x200xf32>,
    %c0_171 = arith.constant 0 : index
    %c1_172 = arith.constant 1 : index
    %134 = vector.load %arg13[%c0_171, %c1_172] : memref<8x222xf32, #tpu.memory_space<vmem>>, vector<8x200xf32>
    %c8_173 = arith.constant 8 : index
    %c0_174 = arith.constant 0 : index
    %135 = vector.load %arg11[%c8_173, %c0_174] : memref<72x200xf32, #tpu.memory_space<vmem>>, vector<8x200xf32>
    tpu.vector_store %arg11[%c8_173, %c0_174], %134 {strides = array<i32>} : memref<72x200xf32, #tpu.memory_space<vmem>>, vector<8x200xf32>,
    %c0_175 = arith.constant 0 : index
    %c2_176 = arith.constant 2 : index
    %136 = vector.load %arg13[%c0_175, %c2_176] : memref<8x222xf32, #tpu.memory_space<vmem>>, vector<8x200xf32>
    %c16_177 = arith.constant 16 : index
    %c0_178 = arith.constant 0 : index
    %137 = vector.load %arg11[%c16_177, %c0_178] : memref<72x200xf32, #tpu.memory_space<vmem>>, vector<8x200xf32>
    tpu.vector_store %arg11[%c16_177, %c0_178], %136 {strides = array<i32>} : memref<72x200xf32, #tpu.memory_space<vmem>>, vector<8x200xf32>,
    %c0_179 = arith.constant 0 : index
    %c10_180 = arith.constant 10 : index
    %138 = vector.load %arg13[%c0_179, %c10_180] : memref<8x222xf32, #tpu.memory_space<vmem>>, vector<8x200xf32>
    %c24_181 = arith.constant 24 : index
    %c0_182 = arith.constant 0 : index
    %139 = vector.load %arg11[%c24_181, %c0_182] : memref<72x200xf32, #tpu.memory_space<vmem>>, vector<8x200xf32>
    tpu.vector_store %arg11[%c24_181, %c0_182], %138 {strides = array<i32>} : memref<72x200xf32, #tpu.memory_space<vmem>>, vector<8x200xf32>,
    %c0_183 = arith.constant 0 : index
    %c11_184 = arith.constant 11 : index
    %140 = vector.load %arg13[%c0_183, %c11_184] : memref<8x222xf32, #tpu.memory_space<vmem>>, vector<8x200xf32>
    %c32_185 = arith.constant 32 : index
    %c0_186 = arith.constant 0 : index
    %141 = vector.load %arg11[%c32_185, %c0_186] : memref<72x200xf32, #tpu.memory_space<vmem>>, vector<8x200xf32>
    tpu.vector_store %arg11[%c32_185, %c0_186], %140 {strides = array<i32>} : memref<72x200xf32, #tpu.memory_space<vmem>>, vector<8x200xf32>,
    %c0_187 = arith.constant 0 : index
    %c12_188 = arith.constant 12 : index
    %142 = vector.load %arg13[%c0_187, %c12_188] : memref<8x222xf32, #tpu.memory_space<vmem>>, vector<8x200xf32>
    %c40_189 = arith.constant 40 : index
    %c0_190 = arith.constant 0 : index
    %143 = vector.load %arg11[%c40_189, %c0_190] : memref<72x200xf32, #tpu.memory_space<vmem>>, vector<8x200xf32>
    tpu.vector_store %arg11[%c40_189, %c0_190], %142 {strides = array<i32>} : memref<72x200xf32, #tpu.memory_space<vmem>>, vector<8x200xf32>,
    %c0_191 = arith.constant 0 : index
    %c20_192 = arith.constant 20 : index
    %144 = vector.load %arg13[%c0_191, %c20_192] : memref<8x222xf32, #tpu.memory_space<vmem>>, vector<8x200xf32>
    %c48_193 = arith.constant 48 : index
    %c0_194 = arith.constant 0 : index
    %145 = vector.load %arg11[%c48_193, %c0_194] : memref<72x200xf32, #tpu.memory_space<vmem>>, vector<8x200xf32>
    tpu.vector_store %arg11[%c48_193, %c0_194], %144 {strides = array<i32>} : memref<72x200xf32, #tpu.memory_space<vmem>>, vector<8x200xf32>,
    %c0_195 = arith.constant 0 : index
    %c21_196 = arith.constant 21 : index
    %146 = vector.load %arg13[%c0_195, %c21_196] : memref<8x222xf32, #tpu.memory_space<vmem>>, vector<8x200xf32>
    %c56_197 = arith.constant 56 : index
    %c0_198 = arith.constant 0 : index
    %147 = vector.load %arg11[%c56_197, %c0_198] : memref<72x200xf32, #tpu.memory_space<vmem>>, vector<8x200xf32>
    tpu.vector_store %arg11[%c56_197, %c0_198], %146 {strides = array<i32>} : memref<72x200xf32, #tpu.memory_space<vmem>>, vector<8x200xf32>,
    %c0_199 = arith.constant 0 : index
    %c22_200 = arith.constant 22 : index
    %148 = vector.load %arg13[%c0_199, %c22_200] : memref<8x222xf32, #tpu.memory_space<vmem>>, vector<8x200xf32>
    %c64_201 = arith.constant 64 : index
    %c0_202 = arith.constant 0 : index
    %149 = vector.load %arg11[%c64_201, %c0_202] : memref<72x200xf32, #tpu.memory_space<vmem>>, vector<8x200xf32>
    tpu.vector_store %arg11[%c64_201, %c0_202], %148 {strides = array<i32>} : memref<72x200xf32, #tpu.memory_space<vmem>>, vector<8x200xf32>,
    %c0_203 = arith.constant 0 : index
    %c0_204 = arith.constant 0 : index
    %150 = vector.load %arg11[%c0_203, %c0_204] : memref<72x200xf32, #tpu.memory_space<vmem>>, vector<72x200xf32>
    %cst_205 = arith.constant dense<0.000000e+00> : vector<8x200xf32>
    %151 = tpu.matmul %129, %150, %cst_205 {dimension_numbers = #tpu.dot_dimension_numbers<[1], [0], [0], [1], [0, 0, 1, 1], [], []>} : vector<8x72xf32>, vector<72x200xf32>, vector<8x200xf32> -> vector<8x200xf32>
    %152 = vector.broadcast %131 : vector<8x1xf32> to vector<8x200xf32>
    %153 = arith.addf %151, %152 : vector<8x200xf32>
    %154 = vector.broadcast %61 : vector<1x200xf32> to vector<8x200xf32>
    %155 = arith.mulf %153, %154 : vector<8x200xf32>
    %cst_206 = arith.constant 0.000000e+00 : f32
    %156 = vector.broadcast %cst_206 : f32 to vector<8x200xf32>
    %157 = arith.maximumf %155, %156 : vector<8x200xf32>
    %c0_207 = arith.constant 0 : index
    %c11_208 = arith.constant 11 : index
    %158 = vector.load %arg13[%c0_207, %c11_208] : memref<8x222xf32, #tpu.memory_space<vmem>>, vector<8x200xf32>
    tpu.vector_store %arg13[%c0_207, %c11_208], %157 {strides = array<i32>} : memref<8x222xf32, #tpu.memory_space<vmem>>, vector<8x200xf32>,
    %c3 = arith.constant 3 : index
    %c0_209 = arith.constant 0 : index
    %c0_210 = arith.constant 0 : index
    %159 = vector.load %arg4[%c3, %c0_209, %c0_210] : memref<4x8x72xf32, #tpu.memory_space<vmem>>, vector<1x8x72xf32>
    %160 = vector.shape_cast %159 : vector<1x8x72xf32> to vector<8x72xf32>
    %c3_211 = arith.constant 3 : index
    %c0_212 = arith.constant 0 : index
    %c0_213 = arith.constant 0 : index
    %161 = vector.load %arg5[%c3_211, %c0_212, %c0_213] : memref<4x8x1xf32, #tpu.memory_space<vmem>>, vector<1x8x1xf32>
    %162 = vector.shape_cast %161 : vector<1x8x1xf32> to vector<8x1xf32>
    %c0_214 = arith.constant 0 : index
    %c0_215 = arith.constant 0 : index
    %163 = vector.load %arg13[%c0_214, %c0_215] : memref<8x222xf32, #tpu.memory_space<vmem>>, vector<8x200xf32>
    %c0_216 = arith.constant 0 : index
    %c0_217 = arith.constant 0 : index
    %164 = vector.load %arg11[%c0_216, %c0_217] : memref<72x200xf32, #tpu.memory_space<vmem>>, vector<8x200xf32>
    tpu.vector_store %arg11[%c0_216, %c0_217], %163 {strides = array<i32>} : memref<72x200xf32, #tpu.memory_space<vmem>>, vector<8x200xf32>,
    %c0_218 = arith.constant 0 : index
    %c1_219 = arith.constant 1 : index
    %165 = vector.load %arg13[%c0_218, %c1_219] : memref<8x222xf32, #tpu.memory_space<vmem>>, vector<8x200xf32>
    %c8_220 = arith.constant 8 : index
    %c0_221 = arith.constant 0 : index
    %166 = vector.load %arg11[%c8_220, %c0_221] : memref<72x200xf32, #tpu.memory_space<vmem>>, vector<8x200xf32>
    tpu.vector_store %arg11[%c8_220, %c0_221], %165 {strides = array<i32>} : memref<72x200xf32, #tpu.memory_space<vmem>>, vector<8x200xf32>,
    %c0_222 = arith.constant 0 : index
    %c2_223 = arith.constant 2 : index
    %167 = vector.load %arg13[%c0_222, %c2_223] : memref<8x222xf32, #tpu.memory_space<vmem>>, vector<8x200xf32>
    %c16_224 = arith.constant 16 : index
    %c0_225 = arith.constant 0 : index
    %168 = vector.load %arg11[%c16_224, %c0_225] : memref<72x200xf32, #tpu.memory_space<vmem>>, vector<8x200xf32>
    tpu.vector_store %arg11[%c16_224, %c0_225], %167 {strides = array<i32>} : memref<72x200xf32, #tpu.memory_space<vmem>>, vector<8x200xf32>,
    %c0_226 = arith.constant 0 : index
    %c10_227 = arith.constant 10 : index
    %169 = vector.load %arg13[%c0_226, %c10_227] : memref<8x222xf32, #tpu.memory_space<vmem>>, vector<8x200xf32>
    %c24_228 = arith.constant 24 : index
    %c0_229 = arith.constant 0 : index
    %170 = vector.load %arg11[%c24_228, %c0_229] : memref<72x200xf32, #tpu.memory_space<vmem>>, vector<8x200xf32>
    tpu.vector_store %arg11[%c24_228, %c0_229], %169 {strides = array<i32>} : memref<72x200xf32, #tpu.memory_space<vmem>>, vector<8x200xf32>,
    %c0_230 = arith.constant 0 : index
    %c11_231 = arith.constant 11 : index
    %171 = vector.load %arg13[%c0_230, %c11_231] : memref<8x222xf32, #tpu.memory_space<vmem>>, vector<8x200xf32>
    %c32_232 = arith.constant 32 : index
    %c0_233 = arith.constant 0 : index
    %172 = vector.load %arg11[%c32_232, %c0_233] : memref<72x200xf32, #tpu.memory_space<vmem>>, vector<8x200xf32>
    tpu.vector_store %arg11[%c32_232, %c0_233], %171 {strides = array<i32>} : memref<72x200xf32, #tpu.memory_space<vmem>>, vector<8x200xf32>,
    %c0_234 = arith.constant 0 : index
    %c12_235 = arith.constant 12 : index
    %173 = vector.load %arg13[%c0_234, %c12_235] : memref<8x222xf32, #tpu.memory_space<vmem>>, vector<8x200xf32>
    %c40_236 = arith.constant 40 : index
    %c0_237 = arith.constant 0 : index
    %174 = vector.load %arg11[%c40_236, %c0_237] : memref<72x200xf32, #tpu.memory_space<vmem>>, vector<8x200xf32>
    tpu.vector_store %arg11[%c40_236, %c0_237], %173 {strides = array<i32>} : memref<72x200xf32, #tpu.memory_space<vmem>>, vector<8x200xf32>,
    %c0_238 = arith.constant 0 : index
    %c20_239 = arith.constant 20 : index
    %175 = vector.load %arg13[%c0_238, %c20_239] : memref<8x222xf32, #tpu.memory_space<vmem>>, vector<8x200xf32>
    %c48_240 = arith.constant 48 : index
    %c0_241 = arith.constant 0 : index
    %176 = vector.load %arg11[%c48_240, %c0_241] : memref<72x200xf32, #tpu.memory_space<vmem>>, vector<8x200xf32>
    tpu.vector_store %arg11[%c48_240, %c0_241], %175 {strides = array<i32>} : memref<72x200xf32, #tpu.memory_space<vmem>>, vector<8x200xf32>,
    %c0_242 = arith.constant 0 : index
    %c21_243 = arith.constant 21 : index
    %177 = vector.load %arg13[%c0_242, %c21_243] : memref<8x222xf32, #tpu.memory_space<vmem>>, vector<8x200xf32>
    %c56_244 = arith.constant 56 : index
    %c0_245 = arith.constant 0 : index
    %178 = vector.load %arg11[%c56_244, %c0_245] : memref<72x200xf32, #tpu.memory_space<vmem>>, vector<8x200xf32>
    tpu.vector_store %arg11[%c56_244, %c0_245], %177 {strides = array<i32>} : memref<72x200xf32, #tpu.memory_space<vmem>>, vector<8x200xf32>,
    %c0_246 = arith.constant 0 : index
    %c22_247 = arith.constant 22 : index
    %179 = vector.load %arg13[%c0_246, %c22_247] : memref<8x222xf32, #tpu.memory_space<vmem>>, vector<8x200xf32>
    %c64_248 = arith.constant 64 : index
    %c0_249 = arith.constant 0 : index
    %180 = vector.load %arg11[%c64_248, %c0_249] : memref<72x200xf32, #tpu.memory_space<vmem>>, vector<8x200xf32>
    tpu.vector_store %arg11[%c64_248, %c0_249], %179 {strides = array<i32>} : memref<72x200xf32, #tpu.memory_space<vmem>>, vector<8x200xf32>,
    %c0_250 = arith.constant 0 : index
    %c0_251 = arith.constant 0 : index
    %181 = vector.load %arg11[%c0_250, %c0_251] : memref<72x200xf32, #tpu.memory_space<vmem>>, vector<72x200xf32>
    %cst_252 = arith.constant dense<0.000000e+00> : vector<8x200xf32>
    %182 = tpu.matmul %160, %181, %cst_252 {dimension_numbers = #tpu.dot_dimension_numbers<[1], [0], [0], [1], [0, 0, 1, 1], [], []>} : vector<8x72xf32>, vector<72x200xf32>, vector<8x200xf32> -> vector<8x200xf32>
    %183 = vector.broadcast %162 : vector<8x1xf32> to vector<8x200xf32>
    %184 = arith.addf %182, %183 : vector<8x200xf32>
    %185 = arith.addf %184, %124 : vector<8x200xf32>
    %186 = vector.broadcast %61 : vector<1x200xf32> to vector<8x200xf32>
    %187 = arith.mulf %185, %186 : vector<8x200xf32>
    %c0_253 = arith.constant 0 : index
    %c0_254 = arith.constant 0 : index
    %c0_255 = arith.constant 0 : index
    %188 = vector.load %arg9[%c0_253, %c0_254, %c0_255] : memref<1x8x200xf32, #tpu.memory_space<vmem>>, vector<1x8x200xf32>
    %189 = vector.shape_cast %188 : vector<1x8x200xf32> to vector<8x200xf32>
    %190 = vector.shape_cast %187 : vector<8x200xf32> to vector<1x8x200xf32>
    tpu.vector_store %arg9[%c0_253, %c0_254, %c0_255], %190 {strides = array<i32>} : memref<1x8x200xf32, #tpu.memory_space<vmem>>, vector<1x8x200xf32>,
    return
  }
  func.func @transform_0(%arg0: i32) -> (i32, i32, i32) {
    %c0_i32 = arith.constant 0 : i32
    %c0_i32_0 = arith.constant 0 : i32
    %c0_i32_1 = arith.constant 0 : i32
    return %arg0, %c0_i32, %c0_i32_0 : i32, i32, i32
  }
  func.func @transform_1(%arg0: i32) -> (i32, i32) {
    %c0_i32 = arith.constant 0 : i32
    %c0_i32_0 = arith.constant 0 : i32
    %c0_i32_1 = arith.constant 0 : i32
    return %c0_i32, %c0_i32_0 : i32, i32
  }
  func.func @transform_2(%arg0: i32) -> (i32, i32) {
    %c0_i32 = arith.constant 0 : i32
    %c0_i32_0 = arith.constant 0 : i32
    %c0_i32_1 = arith.constant 0 : i32
    return %c0_i32, %c0_i32_0 : i32, i32
  }
  func.func @transform_3(%arg0: i32) -> (i32, i32, i32) {
    %c0_i32 = arith.constant 0 : i32
    %c0_i32_0 = arith.constant 0 : i32
    %c0_i32_1 = arith.constant 0 : i32
    %c0_i32_2 = arith.constant 0 : i32
    return %c0_i32, %c0_i32_0, %c0_i32_1 : i32, i32, i32
  }
  func.func @transform_4(%arg0: i32) -> (i32, i32, i32) {
    %c0_i32 = arith.constant 0 : i32
    %c0_i32_0 = arith.constant 0 : i32
    %c0_i32_1 = arith.constant 0 : i32
    %c0_i32_2 = arith.constant 0 : i32
    return %c0_i32, %c0_i32_0, %c0_i32_1 : i32, i32, i32
  }
  func.func @transform_5(%arg0: i32) -> (i32, i32) {
    %c0_i32 = arith.constant 0 : i32
    %c0_i32_0 = arith.constant 0 : i32
    %c0_i32_1 = arith.constant 0 : i32
    return %c0_i32, %c0_i32_0 : i32, i32
  }
  func.func @transform_6(%arg0: i32) -> (i32, i32) {
    %c0_i32 = arith.constant 0 : i32
    %c0_i32_0 = arith.constant 0 : i32
    %c0_i32_1 = arith.constant 0 : i32
    return %c0_i32, %c0_i32_0 : i32, i32
  }
  func.func @transform_7(%arg0: i32) -> (i32, i32) {
    %c0_i32 = arith.constant 0 : i32
    %c0_i32_0 = arith.constant 0 : i32
    %c0_i32_1 = arith.constant 0 : i32
    return %c0_i32, %c0_i32_0 : i32, i32
  }
  func.func @transform_8(%arg0: i32) -> (i32, i32, i32) {
    %c0_i32 = arith.constant 0 : i32
    %c0_i32_0 = arith.constant 0 : i32
    %c0_i32_1 = arith.constant 0 : i32
    return %arg0, %c0_i32, %c0_i32_0 : i32, i32, i32
  }
}

</mosaic_0001>

<bundles_post_ra>
// kernel: conv_sequence_forward.1
= control target key start
LH: loop header
LB: loop body
LE: loop exit
PB: predicated region body
PF: predicated region fallthrough
CT: control target
= control target key end

     0   :  { %s3058_s27 = smov 0   ;;  %s4224_s0 = inlined_call_operand.vmem [shape: f32[2,8,686], index: 0, kind: input, shape index: {}]   ;;  %s4225_s1 = inlined_call_operand.vmem [shape: f32[8,72], index: 1, kind: input, shape index: {}]   ;;  %s4226_s2 = inlined_call_operand.vmem [shape: f32[8,1], index: 2, kind: input, shape index: {}]   ;;  %s4227_s3 = inlined_call_operand.vmem [shape: f32[4,8,72], index: 3, kind: input, shape index: {}]   ;;  %s4228_s4 = inlined_call_operand.vmem [shape: f32[4,8,1], index: 4, kind: input, shape index: {}]   ;;  %s4229_s5 = inlined_call_operand.vmem [shape: f32[1,648], index: 5, kind: input, shape index: {}]   ;;  %s4230_s6 = inlined_call_operand.vmem [shape: f32[1,200], index: 6, kind: input, shape index: {}]   ;;  %s4231_s7 = inlined_call_operand.vmem [shape: f32[648,200], index: 7, kind: input, shape index: {}]   ;;  %s4232_s8 = inlined_call_operand.vmem [shape: f32[2,8,200], index: 8, kind: output, shape index: {}]  }
   0x1 LB: > { %s2589_s28 = sadd.s32 4294967295, %s2994_s27   ;;  %p2593_p0 = scmp.ge.s32.totalorder %s2994_s27, 1  ;;  %s2994_s27 = sphi %s3058_s27, %s18_s27  }
   0x2   : > { %p262_p1 = scmp.lt.s32.totalorder %s2994_s27, 3 }
   0x4   : > { %p263_p2 = pnand %p2593_p0, %p262_p1 }
   0x5   : > { %p296_p3 = scmp.lt.s32.totalorder (!%p263_p2), %s2589_s28, 1  ;;  %s2996_s11 = smov (!%p263_p2), 127   ;;  %v3003_v5 = vmov (!%p263_p2), 0.0   ;;  %vm327_vm0 = vcmask (!%p263_p2), 64512   ;;  %v315_v7 = vld [vmem:[%s4226_s2] sm:$0xff] (!%p263_p2)  ;;  %v3005_v8 = vmov (!%p263_p2), 0  }
   0x6   : > { %266 = sbr.rel (%p263_p2) target bundleno = 2967 (0xb97), region = 52  ;;  %s2997_s12 = smov (!%p263_p2), 126   ;;  %792 = vmatprep.mubr.f32.mxu0 (!%p263_p2), %v3003_v5  ;;  %863 = vmatprep.mubr.f32.mxu1 (!%p263_p2), %v3003_v5  ;;  %vm353_vm1 = vcmask (!%p263_p2), 1039360   ;;  %vm395_vm2 = vcmask (!%p263_p2), 1031168   ;;  %vm437_vm3 = vcmask (!%p263_p2), 900096   ;;  %vm479_vm4 = vcmask (!%p263_p2), 891904  }
   0x7   : > { %s2998_s13 = smov (!%p263_p2), 110   ;;  %s2999_s14 = smov (!%p263_p2), 109   ;;  %2916 = vset.pattern.permute.xlu0 (!%p263_p2), %v3005_v8  ;;  %2987 = vset.pattern.permute.xlu1 (!%p263_p2), %v3005_v8  ;;  %vm521_vm5 = vcmask (!%p263_p2), 883712   ;;  %vm563_vm6 = vcmask (!%p263_p2), 752640   ;;  %vm605_vm7 = vcmask (!%p263_p2), 744448   ;;  %vm647_vm8 = vcmask (!%p263_p2), 736256  }
   0x8   : > { %s3000_s15 = smov (!%p263_p2), 108   ;;  %s3001_s16 = smov (!%p263_p2), 92   ;;  %vm724_vm9 = vcmask (!%p263_p2), 588800   ;;  %vm306_vm10 = vcmask (!%p263_p2), 154624   ;;  %vm308_vm11 = vcmask (!%p263_p2), 376024   ;;  %vm1008_vm12 = vcmask (!%p263_p2), 1047704  }
   0x9   : > { %s3002_s17 = smov (!%p263_p2), 91   ;;  %s3004_s18 = smov (!%p263_p2), 90   ;;  %307 = vst.msk [vmem:[#allocation4] sm:$0xff] (!%p263_p2), %vm306_vm10, %v3003_v5  ;;  %vm1014_vm13 = vcmask (!%p263_p2), 220160   ;;  %vm310_vm14 = vcmask (!%p263_p2), 89088   ;;  %vm312_vm15 = vcmask (!%p263_p2), 769688  }
   0xa   : > { %s3006_s25 = smov (!%p263_p2), 19   ;;  %309 = vst.msk [vmem:[#allocation4 + $0x28] sm:$0xff] (!%p263_p2), %vm308_vm11, %v3003_v5  ;;  %s3007_s19 = smov (!%p263_p2), 11  }
   0xb   : > { %311 = vst.msk [vmem:[#allocation5] sm:$0xff] (!%p263_p2), %vm310_vm14, %v3003_v5  ;;  %s3008_s20 = smov (!%p263_p2), 118   ;;  %s3009_s21 = smov (!%p263_p2), 117  }
   0xc   : > { %313 = vst.msk [vmem:[#allocation5 + $0x8] sm:$0xff] (!%p263_p2), %vm312_vm15, %v3003_v5  ;;  %s3010_s22 = smov (!%p263_p2), 116   ;;  %s3011_s23 = smov (!%p263_p2), 107  }
   0xd   : > { %s4234_s28 = smov (!%p296_p3, %s2589_s28), 1  ;;  %s3012_s24 = smov 106  }
   0xe   : > { %s2890_s29 = smul.u32 48, %s4234_s28 }
  0x10   : > { %s3072_s10 = scalar_lea.vmem %s4224_s0, %s2890_s29 }
  0x11   : > { %v3075_v0 = vld [vmem:[%s3072_s10 + $0x8] sm:$0xff]  ;;  %v3078_v1 = vld [vmem:[%s3072_s10] sm:$0xff]  ;;  %v3081_v2 = vld [vmem:[%s3072_s10 + $0x10] sm:$0xff] }
  0x12   : > { %343 = vrot.lane.b32.xlu0 %v3075_v0, %s2996_s11  ;;  %341 = vrot.lane.b32.xlu1 %v3078_v1, %s2996_s11  ;;  %v3088_v3 = vld [vmem:[%s3072_s10 + $0x18] sm:$0xff]  ;;  %v3091_v4 = vld [vmem:[%s3072_s10 + $0x20] sm:$0xff] }
  0x13   : > { %v334_v6 = vld [vmem:[%s3072_s10 + $0x28] sm:$0xff] }
  0x14   : > { %328 = vst.msk [vmem:[#allocation2 + $0x28] sm:$0xff] %vm327_vm0, %v334_v6 }
  0x16   : > { %345 = vrot.lane.b32.xlu0 %v3081_v2, %s2996_s11  ;;  %347 = vrot.lane.b32.xlu1 %v3088_v3, %s2996_s11 }
  0x1a   : > { %349 = vrot.lane.b32.xlu0 %v3091_v4, %s2996_s11  ;;  %385 = vrot.lane.b32.xlu1 %v3075_v0, %s2997_s12 }
  0x1e   : > { %387 = vrot.lane.b32.xlu0 %v3081_v2, %s2997_s12  ;;  %427 = vrot.lane.b32.xlu1 %v3075_v0, %s2998_s13 }
  0x22   : > { %429 = vrot.lane.b32.xlu0 %v3081_v2, %s2998_s13  ;;  %383 = vrot.lane.b32.xlu1 %v3078_v1, %s2997_s12 }
  0x26   : > { %389 = vrot.lane.b32.xlu0 %v3088_v3, %s2997_s12  ;;  %391 = vrot.lane.b32.xlu1 %v3091_v4, %s2997_s12 }
  0x2a   : > { %425 = vrot.lane.b32.xlu0 %v3078_v1, %s2998_s13  ;;  %431 = vrot.lane.b32.xlu1 %v3088_v3, %s2998_s13 }
  0x2e   : > { %433 = vrot.lane.b32.xlu0 %v3091_v4, %s2998_s13  ;;  %469 = vrot.lane.b32.xlu1 %v3075_v0, %s2999_s14 }
  0x32   : > { %471 = vrot.lane.b32.xlu0 %v3081_v2, %s2999_s14  ;;  %511 = vrot.lane.b32.xlu1 %v3075_v0, %s3000_s15 }
  0x36   : > { %513 = vrot.lane.b32.xlu0 %v3081_v2, %s3000_s15  ;;  %467 = vrot.lane.b32.xlu1 %v3078_v1, %s2999_s14 }
  0x3a   : > { %473 = vrot.lane.b32.xlu0 %v3088_v3, %s2999_s14  ;;  %475 = vrot.lane.b32.xlu1 %v3091_v4, %s2999_s14 }
  0x3e   : > { %509 = vrot.lane.b32.xlu0 %v3078_v1, %s3000_s15  ;;  %515 = vrot.lane.b32.xlu1 %v3088_v3, %s3000_s15 }
  0x42   : > { %517 = vrot.lane.b32.xlu0 %v3091_v4, %s3000_s15  ;;  %553 = vrot.lane.b32.xlu1 %v3075_v0, %s3001_s16 }
  0x46   : > { %555 = vrot.lane.b32.xlu0 %v3081_v2, %s3001_s16  ;;  %595 = vrot.lane.b32.xlu1 %v3075_v0, %s3002_s17 }
  0x4a   : > { %597 = vrot.lane.b32.xlu0 %v3081_v2, %s3002_s17  ;;  %551 = vrot.lane.b32.xlu1 %v3078_v1, %s3001_s16 }
  0x4e   : > { %557 = vrot.lane.b32.xlu0 %v3088_v3, %s3001_s16  ;;  %559 = vrot.lane.b32.xlu1 %v3091_v4, %s3001_s16 }
  0x52   : > { %593 = vrot.lane.b32.xlu0 %v3078_v1, %s3002_s17  ;;  %599 = vrot.lane.b32.xlu1 %v3088_v3, %s3002_s17 }
  0x56   : > { %601 = vrot.lane.b32.xlu0 %v3091_v4, %s3002_s17  ;;  %637 = vrot.lane.b32.xlu1 %v3075_v0, %s3004_s18 }
  0x5a   : > { %639 = vrot.lane.b32.xlu0 %v3081_v2, %s3004_s18  ;;  %635 = vrot.lane.b32.xlu1 %v3078_v1, %s3004_s18 }
  0x5e   : > { %641 = vrot.lane.b32.xlu0 %v3088_v3, %s3004_s18  ;;  %643 = vrot.lane.b32.xlu1 %v3091_v4, %s3004_s18 }
  0x62   : > { %351 = vrot.lane.b32.xlu0 %v334_v6, %s2996_s11  ;;  %393 = vrot.lane.b32.xlu1 %v334_v6, %s2997_s12 }
  0x66   : > { %435 = vrot.lane.b32.xlu0 %v334_v6, %s2998_s13  ;;  %477 = vrot.lane.b32.xlu1 %v334_v6, %s2999_s14 }
  0x6a   : > { %519 = vrot.lane.b32.xlu0 %v334_v6, %s3000_s15  ;;  %561 = vrot.lane.b32.xlu1 %v334_v6, %s3001_s16 }
  0x6e   : > { %603 = vrot.lane.b32.xlu0 %v334_v6, %s3002_s17  ;;  %645 = vrot.lane.b32.xlu1 %v334_v6, %s3004_s18 }
  0x72   : > { %721 = vperm.xlu0 %2916, %v315_v7  }
  0x84   : > { %v344_v9 = vpop.permute.xlu0 %343  ;;  %v342_v10 = vpop.permute.xlu1 %341 }
  0x85   : > { %v354_v11 = vsel %vm353_vm1, %v342_v10, %v344_v9 }
  0x86   : > { %v2616_v17 = vpack.c.bf16 %v354_v11, %v3078_v1 }
  0x88   : > { %v346_v12 = vpop.permute.xlu0 %345  ;;  %v348_v13 = vpop.permute.xlu1 %347 }
  0x89   : > { %v355_v14 = vsel %vm353_vm1, %v344_v9, %v346_v12  ;;  %v356_v15 = vsel %vm353_vm1, %v346_v12, %v348_v13 }
  0x8a   : > { %v2614_v16 = vpack.c.bf16 %v355_v14, %v3075_v0  ;;  %v2632_v22 = vpack.c.bf16 %v356_v15, %v3081_v2 }
  0x8c   : > { %v3189_v18 = vpop.permute.xlu0 %349  ;;  %v386_v19 = vpop.permute.xlu1 %385  ;;  %2615 = vmatprep.subr.bf16.mxu0 %v2614_v16 }
  0x8d   : > { %v357_v20 = vsel %vm353_vm1, %v348_v13, %v3189_v18  ;;  %2617 = vmatpush1.bf16.msra.mxu0 %v2616_v17 }
  0x8e   : > { %v2630_v21 = vpack.c.bf16 %v357_v20, %v3088_v3 }
  0x90   : > { %v388_v23 = vpop.permute.xlu0 %387  ;;  %v428_v24 = vpop.permute.xlu1 %427  ;;  %2631 = vmatprep.subr.bf16.mxu1 %v2630_v21 }
  0x91   : > { %v397_v25 = vsel %vm395_vm2, %v386_v19, %v388_v23  ;;  %2633 = vmatpush1.bf16.msra.mxu1 %v2632_v22 }
  0x94   : > { %v430_v26 = vpop.permute.xlu0 %429  ;;  %v384_v27 = vpop.permute.xlu1 %383 }
  0x95   : > { %v439_v28 = vsel %vm437_vm3, %v428_v24, %v430_v26  ;;  %v396_v29 = vsel %vm395_vm2, %v384_v27, %v386_v19 }
  0x96   : > { %v2618_v30 = vpack.c.bf16 %v439_v28, %v397_v25 }
  0x98   : > { %v390_v31 = vpop.permute.xlu0 %389  ;;  %v3198_v32 = vpop.permute.xlu1 %391  ;;  %2619 = vmatprep.subr.bf16.mxu0 %v2618_v30 }
  0x99   : > { %v398_v33 = vsel %vm395_vm2, %v388_v23, %v390_v31  ;;  %v399_v34 = vsel %vm395_vm2, %v390_v31, %v3198_v32 }
  0x9c   : > { %v426_v35 = vpop.permute.xlu0 %425  ;;  %v432_v36 = vpop.permute.xlu1 %431 }
  0x9d   : > { %v438_v37 = vsel %vm437_vm3, %v426_v35, %v428_v24  ;;  %v440_v38 = vsel %vm437_vm3, %v430_v26, %v432_v36 }
  0x9e   : > { %v2620_v39 = vpack.c.bf16 %v438_v37, %v396_v29  ;;  %v2636_v44 = vpack.c.bf16 %v440_v38, %v398_v33  ;;  %v3236_v33 = vld [vmem:[%s4225_s1] sm:$0xff] }
  0xa0   : > { %v3205_v40 = vpop.permute.xlu0 %433  ;;  %v470_v41 = vpop.permute.xlu1 %469  ;;  %2621 = vmatpush1.bf16.msra.mxu0 %v2620_v39 }
  0xa1   : > { %v441_v42 = vsel %vm437_vm3, %v432_v36, %v3205_v40 }
  0xa2   : > { %v2634_v43 = vpack.c.bf16 %v441_v42, %v399_v34 }
  0xa4   : > { %v472_v45 = vpop.permute.xlu0 %471  ;;  %v512_v46 = vpop.permute.xlu1 %511  ;;  %2635 = vmatprep.subr.bf16.mxu1 %v2634_v43 }
  0xa5   : > { %v481_v47 = vsel %vm479_vm4, %v470_v41, %v472_v45  ;;  %2637 = vmatpush1.bf16.msra.mxu1 %v2636_v44 }
  0xa8   : > { %v514_v48 = vpop.permute.xlu0 %513  ;;  %v468_v49 = vpop.permute.xlu1 %467 }
  0xa9   : > { %v523_v50 = vsel %vm521_vm5, %v512_v46, %v514_v48  ;;  %v480_v51 = vsel %vm479_vm4, %v468_v49, %v470_v41 }
  0xaa   : > { %v2622_v52 = vpack.c.bf16 %v523_v50, %v481_v47 }
  0xac   : > { %v474_v53 = vpop.permute.xlu0 %473  ;;  %v3212_v54 = vpop.permute.xlu1 %475  ;;  %2623 = vmatprep.subr.bf16.mxu0 %v2622_v52 }
  0xad   : > { %v482_v55 = vsel %vm479_vm4, %v472_v45, %v474_v53  ;;  %v483_v56 = vsel %vm479_vm4, %v474_v53, %v3212_v54 }
  0xb0   : > { %v510_v57 = vpop.permute.xlu0 %509  ;;  %v516_v58 = vpop.permute.xlu1 %515 }
  0xb1   : > { %v522_v59 = vsel %vm521_vm5, %v510_v57, %v512_v46  ;;  %v524_v60 = vsel %vm521_vm5, %v514_v48, %v516_v58 }
  0xb2   : > { %v2624_v61 = vpack.c.bf16 %v522_v59, %v480_v51  ;;  %v2640_v2 = vpack.c.bf16 %v524_v60, %v482_v55 }
  0xb4   : > { %v3219_v62 = vpop.permute.xlu0 %517  ;;  %v554_v63 = vpop.permute.xlu1 %553  ;;  %2625 = vmatpush1.bf16.msra.mxu0 %v2624_v61 }
  0xb5   : > { %v525_v0 = vsel %vm521_vm5, %v516_v58, %v3219_v62 }
  0xb6   : > { %v2638_v1 = vpack.c.bf16 %v525_v0, %v483_v56 }
  0xb8   : > { %v556_v3 = vpop.permute.xlu0 %555  ;;  %v596_v6 = vpop.permute.xlu1 %595  ;;  %2639 = vmatprep.subr.bf16.mxu1 %v2638_v1 }
  0xb9   : > { %v565_v7 = vsel %vm563_vm6, %v554_v63, %v556_v3  ;;  %2641 = vmatpush1.bf16.msra.mxu1 %v2640_v2 }
  0xbc   : > { %v598_v8 = vpop.permute.xlu0 %597  ;;  %v552_v9 = vpop.permute.xlu1 %551 }
  0xbd   : > { %v607_v10 = vsel %vm605_vm7, %v596_v6, %v598_v8  ;;  %v564_v11 = vsel %vm563_vm6, %v552_v9, %v554_v63  ;;  %v941_v9 = vld [vmem:[%s4229_s5] sm:$0x3f] }
  0xbe   : > { %v2626_v12 = vpack.c.bf16 %v607_v10, %v565_v7 }
  0xc0   : > { %v558_v13 = vpop.permute.xlu0 %557  ;;  %v560_v14 = vpop.permute.xlu1 %559  ;;  %2627 = vmatprep.subr.bf16.mxu0 %v2626_v12 }
  0xc1   : > { %v566_v15 = vsel %vm563_vm6, %v556_v3, %v558_v13  ;;  %v567_v16 = vsel %vm563_vm6, %v558_v13, %v560_v14 }
  0xc4   : > { %v594_v17 = vpop.permute.xlu0 %593  ;;  %v600_v19 = vpop.permute.xlu1 %599 }
  0xc5   : > { %v606_v20 = vsel %vm605_vm7, %v594_v17, %v596_v6  ;;  %v608_v21 = vsel %vm605_vm7, %v598_v8, %v600_v19  ;;  %v943_v6 = vlaneseq }
  0xc6   : > { %v2628_v22 = vpack.c.bf16 %v606_v20, %v564_v11  ;;  %v2644_v27 = vpack.c.bf16 %v608_v21, %v566_v15 }
  0xc7   : > { %v3271_v7 = vshrl.u32 %v943_v6, 7  ;;  %v1258_v6 = vld [vmem:[%s4231_s7 + $0xa8] sm:$0xff] }
  0xc8   : > { %v602_v23 = vpop.permute.xlu0 %601  ;;  %v638_v24 = vpop.permute.xlu1 %637  ;;  %2629 = vmatpush1.bf16.msra.mxu0 %v2628_v22 }
  0xc9   : > { %v609_v25 = vsel %vm605_vm7, %v600_v19, %v602_v23  ;;  %v945_v8 = vsub.s32 0, %v3271_v7  ;;  %v949_v11 = vsub.s32 1, %v3271_v7  ;;  %v953_v13 = vsub.s32 2, %v3271_v7 }
  0xca   : > { %v2642_v26 = vpack.c.bf16 %v609_v25, %v567_v16  ;;  %v957_v22 = vsub.s32 3, %v3271_v7 }
  0xcb   : > { %v946_v12 = vrot.slane %v941_v9, %v945_v8  ;;  %v950_v17 = vrot.slane %v941_v9, %v949_v11  ;;  %v954_v21 = vrot.slane %v941_v9, %v953_v13  ;;  %v1257_v13 = vld [vmem:[%s4231_s7 + $0xa0] sm:$0xff] }
  0xcc   : > { %v640_v28 = vpop.permute.xlu0 %639  ;;  %v636_v29 = vpop.permute.xlu1 %635  ;;  %2643 = vmatprep.subr.bf16.mxu1 %v2642_v26 }
  0xcd   : > { %v649_v30 = vsel %vm647_vm8, %v638_v24, %v640_v28  ;;  %v648_v31 = vsel %vm647_vm8, %v636_v29, %v638_v24  ;;  %2645 = vmatpush1.bf16.msra.mxu1 %v2644_v27  ;;  %v958_v29 = vrot.slane %v941_v9, %v957_v22  ;;  %v1263_v22 = vld [vmem:[%s4231_s7 + $0xd0] sm:$0xff] }
  0xce   : > { %744 = vmatprep.subr.mxu0 %v649_v30 }
  0xcf   : > { %745 = vmatpush1.msra.mxu0 %v648_v31  ;;  %v961_v31 = vsub.s32 4, %v3271_v7 }
  0xd0   : > { %v642_v34 = vpop.permute.xlu0 %641  ;;  %v644_v35 = vpop.permute.xlu1 %643  ;;  %2597 = vmatmul.mubr.msk.f32.vlgmr.msra.gmra.mrb[0].mxu0 %vm724_vm9, %v3236_v33 }
  0xd1   : > { %v650_v36 = vsel %vm647_vm8, %v640_v28, %v642_v34  ;;  %v651_v37 = vsel %vm647_vm8, %v642_v34, %v644_v35  ;;  %934 = vmatprep.mubr.f32.mxu0 %v3003_v5  ;;  %v962_v34 = vrot.slane %v941_v9, %v961_v31  ;;  %v1267_v31 = vld [vmem:[%s4231_s7 + $0xf0] sm:$0xff] }
  0xd2   : > { %815 = vmatprep.subr.mxu1 %v651_v37 }
  0xd3   : > { %816 = vmatpush1.msra.mxu1 %v650_v36 }
  0xd4   : > { %v352_v38 = vpop.permute.xlu0 %351  ;;  %v394_v39 = vpop.permute.xlu1 %393  ;;  %2598 = vmatmul.mubr.msk.f32.vlgmr.msra.gmra.mrb[0].mxu1 %vm724_vm9, %v3236_v33 }
  0xd5   : > { %v358_v41 = vsel %vm353_vm1, %v3189_v18, %v352_v38  ;;  %370 = vst.msk [vmem:[#allocation2 + $0x58] sm:$0xff] %vm327_vm0, %v352_v38  ;;  %v400_v42 = vsel %vm395_vm2, %v3198_v32, %v394_v39  ;;  %412 = vst.msk [vmem:[#allocation2 + $0x88] sm:$0xff] %vm327_vm0, %v394_v39  ;;  %v670_v18 = vld [vmem:[#allocation2 + $0x28] sm:$0xff] }
  0xd6   : > { %v2648_v51 = vpack.c.bf16 %v358_v41, %v3091_v4 }
  0xd8   : > { %v436_v43 = vpop.permute.xlu0 %435  ;;  %v478_v44 = vpop.permute.xlu1 %477 }
  0xd9   : > { %v442_v45 = vsel %vm437_vm3, %v3205_v40, %v436_v43  ;;  %454 = vst.msk [vmem:[#allocation2 + $0xb8] sm:$0xff] %vm327_vm0, %v436_v43  ;;  %v484_v46 = vsel %vm479_vm4, %v3212_v54, %v478_v44  ;;  %496 = vst.msk [vmem:[#allocation2 + $0xe8] sm:$0xff] %vm327_vm0, %v478_v44  ;;  %v1238_v43 = vld [vmem:[%s4231_s7 + $0x8] sm:$0xff]  ;;  %v1240_v44 = vld [vmem:[%s4231_s7 + $0x18] sm:$0xff]  ;;  %vm1671_vm4 = vcmask 965632  }
  0xda   : > { %v2652_v59 = vpack.c.bf16 %v442_v45, %v400_v42  ;;  %v1237_v45 = vld [vmem:[%s4231_s7] sm:$0xff] }
  0xdc   : > { %v520_v47 = vpop.permute.xlu0 %519  ;;  %v562_v48 = vpop.permute.xlu1 %561  ;;  %v676_v49 = vld [vmem:[#allocation2 + $0x58] sm:$0xff]  ;;  %v682_v52 = vld [vmem:[#allocation2 + $0x88] sm:$0xff] }
  0xdd   : > { %v526_v32 = vsel %vm521_vm5, %v3219_v62, %v520_v47  ;;  %538 = vst.msk [vmem:[#allocation2 + $0x118] sm:$0xff] %vm327_vm0, %v520_v47  ;;  %v568_v50 = vsel %vm563_vm6, %v560_v14, %v562_v48  ;;  %580 = vst.msk [vmem:[#allocation2 + $0x148] sm:$0xff] %vm327_vm0, %v562_v48  ;;  %v2646_v40 = vpack.c.bf16 %v676_v49, %v670_v18  ;;  %v1239_v18 = vld [vmem:[%s4231_s7 + $0x10] sm:$0xff]  ;;  %v1242_v47 = vld [vmem:[%s4231_s7 + $0x28] sm:$0xff] }
  0xde   : > { %v2656_v62 = vpack.c.bf16 %v526_v32, %v484_v46  ;;  %v2662_v46 = vpack.c.bf16 %v1240_v44, %v1238_v43  ;;  %v1244_v48 = vld [vmem:[%s4231_s7 + $0x38] sm:$0xff]  ;;  %v2664_v49 = vpack.c.bf16 %v1239_v18, %v1237_v45  ;;  %v1274_v43 = vld [vmem:[%s4231_s7 + $0x128] sm:$0xff]  ;;  %v1275_v18 = vld [vmem:[%s4231_s7 + $0x130] sm:$0xff] }
  0xdf   : > { %2647 = vmatprep.subr.bf16.mxu0 %v2646_v40  ;;  %v2666_v32 = vpack.c.bf16 %v1244_v48, %v1242_v47  ;;  %v1243_v40 = vld [vmem:[%s4231_s7 + $0x30] sm:$0xff]  ;;  %v1276_v44 = vld [vmem:[%s4231_s7 + $0x138] sm:$0xff]  ;;  %v1278_v48 = vld [vmem:[%s4231_s7 + $0x148] sm:$0xff] }
  0xe0   : > { %v604_v53 = vpop.permute.xlu0 %603  ;;  %v646_v54 = vpop.permute.xlu1 %645  ;;  %2649 = vmatpush1.bf16.msra.mxu0 %v2648_v51  ;;  %v688_v55 = vld [vmem:[#allocation2 + $0xb8] sm:$0xff]  ;;  %v694_v60 = vld [vmem:[#allocation2 + $0xe8] sm:$0xff]  ;;  %2663 = vmatprep.subr.bf16.mxu1 %v2662_v46  ;;  %v2698_v45 = vpack.c.bf16 %v1276_v44, %v1274_v43  ;;  %v1273_v46 = vld [vmem:[%s4231_s7 + $0x120] sm:$0xff] }
  0xe1   : > { %v610_v56 = vsel %vm605_vm7, %v602_v23, %v604_v53  ;;  %622 = vst.msk [vmem:[#allocation2 + $0x178] sm:$0xff] %vm327_vm0, %v604_v53  ;;  %v652_v57 = vsel %vm647_vm8, %v644_v35, %v646_v54  ;;  %664 = vst.msk [vmem:[#allocation2 + $0x1a8] sm:$0xff] %vm327_vm0, %v646_v54  ;;  %v2650_v58 = vpack.c.bf16 %v688_v55, %v682_v52  ;;  %v1246_v51 = vld [vmem:[%s4231_s7 + $0x48] sm:$0xff]  ;;  %v1248_v52 = vld [vmem:[%s4231_s7 + $0x58] sm:$0xff]  ;;  %2665 = vmatpush1.bf16.msra.mxu1 %v2664_v49 }
  0xe2   : > { %v2660_v2 = vpack.c.bf16 %v610_v56, %v568_v50  ;;  %v1241_v50 = vld [vmem:[%s4231_s7 + $0x20] sm:$0xff]  ;;  %2667 = vmatprep.subr.bf16.mxu1 %v2666_v32  ;;  %v2670_v54 = vpack.c.bf16 %v1248_v52, %v1246_v51  ;;  %v1247_v56 = vld [vmem:[%s4231_s7 + $0x50] sm:$0xff]  ;;  %v2700_v47 = vpack.c.bf16 %v1275_v18, %v1273_v46  ;;  %v1280_v49 = vld [vmem:[%s4231_s7 + $0x158] sm:$0xff] }
  0xe3   : > { %2651 = vmatprep.subr.bf16.mxu0 %v2650_v58  ;;  %v2668_v53 = vpack.c.bf16 %v1243_v40, %v1241_v50  ;;  %v1245_v55 = vld [vmem:[%s4231_s7 + $0x40] sm:$0xff]  ;;  %v1252_v58 = vld [vmem:[%s4231_s7 + $0x78] sm:$0xff]  ;;  %v2702_v32 = vpack.c.bf16 %v1280_v49, %v1278_v48  ;;  %v1279_v40 = vld [vmem:[%s4231_s7 + $0x150] sm:$0xff] }
  0xe4   : > { %2653 = vmatpush1.bf16.msra.mxu0 %v2652_v59  ;;  %v700_v4 = vld [vmem:[#allocation2 + $0x118] sm:$0xff]  ;;  %v706_v63 = vld [vmem:[#allocation2 + $0x148] sm:$0xff]  ;;  %v2672_v59 = vpack.c.bf16 %v1247_v56, %v1245_v55  ;;  %v1277_v50 = vld [vmem:[%s4231_s7 + $0x140] sm:$0xff] }
  0xe5   : > { %v2654_v61 = vpack.c.bf16 %v700_v4, %v694_v60  ;;  %2669 = vmatpush1.bf16.msra.mxu1 %v2668_v53  ;;  %v1249_v4 = vld [vmem:[%s4231_s7 + $0x60] sm:$0xff]  ;;  %v2704_v51 = vpack.c.bf16 %v1279_v40, %v1277_v50  ;;  %v1282_v53 = vld [vmem:[%s4231_s7 + $0x168] sm:$0xff]  ;;  %v1304_v46 = vld [vmem:[%s4231_s7 + $0x218] sm:$0xff] }
  0xe6   : > { %2671 = vmatprep.subr.bf16.mxu1 %v2670_v54  ;;  %v1284_v54 = vld [vmem:[%s4231_s7 + $0x178] sm:$0xff]  ;;  %v1281_v56 = vld [vmem:[%s4231_s7 + $0x160] sm:$0xff]  ;;  %v1370_v48 = vld [vmem:[%s4231_s7 + $0x428] sm:$0xff] }
  0xe7   : > { %2655 = vmatprep.subr.bf16.mxu0 %v2654_v61  ;;  %v1251_v61 = vld [vmem:[%s4231_s7 + $0x70] sm:$0xff]  ;;  %v2706_v55 = vpack.c.bf16 %v1284_v54, %v1282_v53  ;;  %v1365_v44 = vld [vmem:[%s4231_s7 + $0x400] sm:$0xff]  ;;  %v1372_v49 = vld [vmem:[%s4231_s7 + $0x438] sm:$0xff] }
  0xe8   : > { %2657 = vmatpush1.bf16.msra.mxu0 %v2656_v62  ;;  %v712_v0 = vld [vmem:[#allocation2 + $0x178] sm:$0xff]  ;;  %v718_v3 = vld [vmem:[#allocation2 + $0x1a8] sm:$0xff]  ;;  %v1369_v50 = vld [vmem:[%s4231_s7 + $0x420] sm:$0xff] }
  0xe9   : > { %v2658_v1 = vpack.c.bf16 %v712_v0, %v706_v63  ;;  %v1254_v62 = vld [vmem:[%s4231_s7 + $0x88] sm:$0xff]  ;;  %v1256_v63 = vld [vmem:[%s4231_s7 + $0x98] sm:$0xff]  ;;  %2673 = vmatpush1.bf16.msra.mxu1 %v2672_v59  ;;  %v2676_v0 = vpack.c.bf16 %v1251_v61, %v1249_v4  ;;  %v1371_v40 = vld [vmem:[%s4231_s7 + $0x430] sm:$0xff] }
  0xea   : > { %v1376_v53 = vld [vmem:[%s4231_s7 + $0x458] sm:$0xff] }
  0xeb   : > { %2659 = vmatprep.subr.bf16.mxu0 %v2658_v1  ;;  %v2678_v1 = vpack.c.bf16 %v1256_v63, %v1254_v62  ;;  %v1286_v62 = vld [vmem:[%s4231_s7 + $0x188] sm:$0xff]  ;;  %v1288_v63 = vld [vmem:[%s4231_s7 + $0x198] sm:$0xff] }
  0xec   : > { %2661 = vmatpush1.bf16.msra.mxu0 %v2660_v2  ;;  %v1253_v2 = vld [vmem:[%s4231_s7 + $0x80] sm:$0xff] }
  0xed   : > { %886 = vmatprep.subr.mxu0 %v718_v3  ;;  %v1255_v3 = vld [vmem:[%s4231_s7 + $0x90] sm:$0xff] }
  0xf0   : > { %887 = vmatpush1.msra.mxu0 %v652_v57  ;;  %v1250_v57 = vld [vmem:[%s4231_s7 + $0x68] sm:$0xff] }
  0xf1   : > { %2599 = vmatmul.mubr.msk.f32.vlgmr.msra.gmra.mrb[2].mxu0 %vm724_vm9, %v3236_v33  ;;  %v722_v10 = vpop.permute.xlu0 %721  ;;  %v965_v33 = vsub.s32 5, %v3271_v7  ;;  %v2674_v60 = vpack.c.bf16 %v1252_v58, %v1250_v57  ;;  %v1283_v57 = vld [vmem:[%s4231_s7 + $0x170] sm:$0xff] }
  0xf2   : > { %v2708_v58 = vpack.c.bf16 %v1283_v57, %v1281_v56  ;;  %v1375_v56 = vld [vmem:[%s4231_s7 + $0x450] sm:$0xff] }
  0xf3   : > { %v966_v36 = vrot.slane %v941_v9, %v965_v33  ;;  %2675 = vmatprep.subr.bf16.mxu1 %v2674_v60  ;;  %v1260_v9 = vld [vmem:[%s4231_s7 + $0xb8] sm:$0xff] }
  0xf4   : > { %2677 = vmatpush1.bf16.msra.mxu1 %v2676_v0 }
  0xf5   : > { %2679 = vmatprep.subr.bf16.mxu1 %v2678_v1  ;;  %v2710_v1 = vpack.c.bf16 %v1288_v63, %v1286_v62  ;;  %v1378_v62 = vld [vmem:[%s4231_s7 + $0x468] sm:$0xff]  ;;  %v1380_v63 = vld [vmem:[%s4231_s7 + $0x478] sm:$0xff] }
 0x1a3   : > { %v794_v14 = vpop.f32.mrb[0].mxu0 }
 0x1a4   : > { %v795_v15 = vadd.f32 %v794_v14, %v722_v10  ;;  %v796_v16 = vpop.f32.mrb[1].mxu0  ;;  %v1259_v14 = vld [vmem:[%s4231_s7 + $0xb0] sm:$0xff] }
 0x1a5   : > { %v797_v20 = vadd.f32 %v796_v16, %v722_v10  ;;  %v1264_v16 = vld [vmem:[%s4231_s7 + $0xd8] sm:$0xff] }
 0x1a6   : > { %v3283_v19 = vadd.f32 %v946_v12, %v795_v15  ;;  %v2682_v12 = vpack.c.bf16 %v1260_v9, %v1258_v6  ;;  %v1262_v15 = vld [vmem:[%s4231_s7 + $0xc8] sm:$0xff] }
 0x1a7   : > { %v865_v23 = vpop.f32.mrb[0].mxu1  ;;  %v3287_v26 = vadd.f32 %v950_v17, %v797_v20  ;;  %v2684_v17 = vpack.c.bf16 %v1259_v14, %v1257_v13  ;;  %v2686_v20 = vpack.c.bf16 %v1264_v16, %v1262_v15  ;;  %v1290_v13 = vld [vmem:[%s4231_s7 + $0x1a8] sm:$0xff]  ;;  %v1292_v14 = vld [vmem:[%s4231_s7 + $0x1b8] sm:$0xff]  ;;  %v1289_v16 = vld [vmem:[%s4231_s7 + $0x1a0] sm:$0xff] }
 0x1a8   : > { %v866_v24 = vadd.f32 %v865_v23, %v722_v10  ;;  %v867_v25 = vpop.f32.mrb[1].mxu1  ;;  %985 = vrot.lane.b32.xlu1 %v3283_v19, %s3006_s25  ;;  %v2714_v15 = vpack.c.bf16 %v1292_v14, %v1290_v13  ;;  %v1382_v13 = vld [vmem:[%s4231_s7 + $0x488] sm:$0xff]  ;;  %v1384_v14 = vld [vmem:[%s4231_s7 + $0x498] sm:$0xff] }
 0x1a9   : > { %v868_v28 = vadd.f32 %v867_v25, %v722_v10  ;;  %v1268_v25 = vld [vmem:[%s4231_s7 + $0xf8] sm:$0xff] }
 0x1aa   : > { %v3289_v27 = vadd.f32 %v954_v21, %v866_v24  ;;  %v1261_v21 = vld [vmem:[%s4231_s7 + $0xc0] sm:$0xff]  ;;  %v1266_v24 = vld [vmem:[%s4231_s7 + $0xe8] sm:$0xff] }
 0x1ab   : > { %v3293_v30 = vadd.f32 %v958_v29, %v868_v28  ;;  %v2688_v23 = vpack.c.bf16 %v1263_v22, %v1261_v21  ;;  %v2690_v28 = vpack.c.bf16 %v1268_v25, %v1266_v24  ;;  %v1265_v29 = vld [vmem:[%s4231_s7 + $0xe0] sm:$0xff]  ;;  %v1294_v21 = vld [vmem:[%s4231_s7 + $0x1c8] sm:$0xff]  ;;  %v1296_v22 = vld [vmem:[%s4231_s7 + $0x1d8] sm:$0xff] }
 0x1ac   : > { %989 = vrot.lane.b32.xlu0 %v3289_v27, %s3006_s25  ;;  %987 = vrot.lane.b32.xlu1 %v3287_v26, %s3006_s25  ;;  %v2692_v33 = vpack.c.bf16 %v1267_v31, %v1265_v29  ;;  %v1293_v24 = vld [vmem:[%s4231_s7 + $0x1c0] sm:$0xff]  ;;  %v1295_v25 = vld [vmem:[%s4231_s7 + $0x1d0] sm:$0xff] }
 0x1ad   : > { %v1298_v29 = vld [vmem:[%s4231_s7 + $0x1e8] sm:$0xff]  ;;  %v1300_v31 = vld [vmem:[%s4231_s7 + $0x1f8] sm:$0xff] }
 0x1b0   : > { %991 = vrot.lane.b32.xlu1 %v3293_v30, %s3006_s25 }
 0x1c4   : > { %v936_v35 = vpop.f32.mrb[2].mxu0 }
 0x1c5   : > { %v937_v37 = vadd.f32 %v936_v35, %v722_v10  ;;  %v938_v38 = vpop.f32.mrb[3].mxu0  ;;  %v1272_v35 = vld [vmem:[%s4231_s7 + $0x118] sm:$0xff] }
 0x1c6   : > { %v939_v39 = vadd.f32 %v938_v38, %v722_v10  ;;  %v2680_v10 = vpack.c.bf16 %v1255_v3, %v1253_v2  ;;  %v1271_v38 = vld [vmem:[%s4231_s7 + $0x110] sm:$0xff]  ;;  %v1285_v2 = vld [vmem:[%s4231_s7 + $0x180] sm:$0xff] }
 0x1c7   : > { %v3299_v41 = vadd.f32 %v962_v34, %v937_v37  ;;  %v1270_v34 = vld [vmem:[%s4231_s7 + $0x108] sm:$0xff]  ;;  %v1269_v37 = vld [vmem:[%s4231_s7 + $0x100] sm:$0xff]  ;;  %v1287_v3 = vld [vmem:[%s4231_s7 + $0x190] sm:$0xff] }
 0x1c8   : > { %v3301_v42 = vadd.f32 %v966_v36, %v939_v39  ;;  %2681 = vmatpush1.bf16.msra.mxu1 %v2680_v10  ;;  %v2694_v36 = vpack.c.bf16 %v1272_v35, %v1270_v34  ;;  %v2696_v39 = vpack.c.bf16 %v1271_v38, %v1269_v37  ;;  %v2712_v6 = vpack.c.bf16 %v1287_v3, %v1285_v2  ;;  %v1297_v34 = vld [vmem:[%s4231_s7 + $0x1e0] sm:$0xff]  ;;  %v1299_v35 = vld [vmem:[%s4231_s7 + $0x1f0] sm:$0xff]  ;;  %v1366_v37 = vld [vmem:[%s4231_s7 + $0x408] sm:$0xff] }
 0x1c9   : > { %993 = vrot.lane.b32.xlu0 %v3299_v41, %s3006_s25  ;;  %2683 = vmatprep.subr.bf16.mxu1 %v2682_v12  ;;  %v1368_v38 = vld [vmem:[%s4231_s7 + $0x418] sm:$0xff]  ;;  %v2802_v2 = vpack.c.bf16 %v1380_v63, %v1378_v62  ;;  %v1377_v3 = vld [vmem:[%s4231_s7 + $0x460] sm:$0xff] }
 0x1ca   : > { %995 = vrot.lane.b32.xlu1 %v3301_v42, %s3006_s25  ;;  %v2790_v43 = vpack.c.bf16 %v1368_v38, %v1366_v37  ;;  %v1394_v38 = vld [vmem:[%s4231_s7 + $0x4e8] sm:$0xff] }
 0x1cc   : > { %2685 = vmatpush1.bf16.msra.mxu1 %v2684_v17  ;;  %v1291_v17 = vld [vmem:[%s4231_s7 + $0x1b0] sm:$0xff]  ;;  %2791 = vmatprep.subr.bf16.mxu0 %v2790_v43 }
 0x1cd   : > { %2687 = vmatprep.subr.bf16.mxu1 %v2686_v20  ;;  %v2716_v20 = vpack.c.bf16 %v1291_v17, %v1289_v16  ;;  %v1381_v16 = vld [vmem:[%s4231_s7 + $0x480] sm:$0xff]  ;;  %v1383_v17 = vld [vmem:[%s4231_s7 + $0x490] sm:$0xff] }
 0x1d0   : > { %2689 = vmatpush1.bf16.msra.mxu1 %v2688_v23  ;;  %v2718_v23 = vpack.c.bf16 %v1296_v22, %v1294_v21  ;;  %v1386_v21 = vld [vmem:[%s4231_s7 + $0x4a8] sm:$0xff]  ;;  %v1388_v22 = vld [vmem:[%s4231_s7 + $0x4b8] sm:$0xff] }
 0x1d1   : > { %2691 = vmatprep.subr.bf16.mxu1 %v2690_v28  ;;  %v2720_v28 = vpack.c.bf16 %v1295_v25, %v1293_v24  ;;  %v2810_v24 = vpack.c.bf16 %v1388_v22, %v1386_v21  ;;  %v1385_v25 = vld [vmem:[%s4231_s7 + $0x4a0] sm:$0xff] }
 0x1d4   : > { %2693 = vmatpush1.bf16.msra.mxu1 %v2692_v33  ;;  %v2722_v33 = vpack.c.bf16 %v1300_v31, %v1298_v29  ;;  %v1390_v31 = vld [vmem:[%s4231_s7 + $0x4c8] sm:$0xff] }
 0x1d5   : > { %2695 = vmatprep.subr.bf16.mxu1 %v2694_v36  ;;  %v2724_v36 = vpack.c.bf16 %v1299_v35, %v1297_v34  ;;  %v1389_v35 = vld [vmem:[%s4231_s7 + $0x4c0] sm:$0xff] }
 0x1d8   : > { %2697 = vmatpush1.bf16.msra.mxu1 %v2696_v39  ;;  %v1302_v39 = vld [vmem:[%s4231_s7 + $0x208] sm:$0xff] }
 0x1d9   : > { %2699 = vmatprep.subr.bf16.mxu1 %v2698_v45  ;;  %v1367_v45 = vld [vmem:[%s4231_s7 + $0x410] sm:$0xff] }
 0x1da   : > { %v2792_v18 = vpack.c.bf16 %v1367_v45, %v1365_v44  ;;  %v1393_v44 = vld [vmem:[%s4231_s7 + $0x4e0] sm:$0xff]  ;;  %v1395_v45 = vld [vmem:[%s4231_s7 + $0x4f0] sm:$0xff] }
 0x1dc   : > { %2701 = vmatpush1.bf16.msra.mxu1 %v2700_v47  ;;  %v2726_v47 = vpack.c.bf16 %v1304_v46, %v1302_v39  ;;  %2793 = vmatpush1.bf16.msra.mxu0 %v2792_v18  ;;  %v1396_v39 = vld [vmem:[%s4231_s7 + $0x4f8] sm:$0xff]  ;;  %v2820_v46 = vpack.c.bf16 %v1395_v45, %v1393_v44  ;;  %v1398_v18 = vld [vmem:[%s4231_s7 + $0x508] sm:$0xff] }
 0x1dd   : > { %2703 = vmatprep.subr.bf16.mxu1 %v2702_v32  ;;  %v2794_v32 = vpack.c.bf16 %v1372_v49, %v1370_v48  ;;  %v2818_v43 = vpack.c.bf16 %v1396_v39, %v1394_v38 }
 0x1df   : > { %2795 = vmatprep.subr.bf16.mxu0 %v2794_v32 }
 0x1e0   : > { %2705 = vmatpush1.bf16.msra.mxu1 %v2704_v51  ;;  %v2796_v51 = vpack.c.bf16 %v1371_v40, %v1369_v50 }
 0x1e1   : > { %2707 = vmatprep.subr.bf16.mxu1 %v2706_v55  ;;  %v1373_v55 = vld [vmem:[%s4231_s7 + $0x440] sm:$0xff] }
 0x1e2   : > { %2797 = vmatpush1.bf16.msra.mxu0 %v2796_v51  ;;  %v2800_v57 = vpack.c.bf16 %v1375_v56, %v1373_v55 }
 0x1e4   : > { %2709 = vmatpush1.bf16.msra.mxu1 %v2708_v58 }
 0x1e5   : > { %2711 = vmatprep.subr.bf16.mxu1 %v2710_v1 }
 0x1e8   : > { %2713 = vmatpush1.bf16.msra.mxu1 %v2712_v6  ;;  %v1379_v6 = vld [vmem:[%s4231_s7 + $0x470] sm:$0xff] }
 0x1e9   : > { %2715 = vmatprep.subr.bf16.mxu1 %v2714_v15  ;;  %v2806_v15 = vpack.c.bf16 %v1384_v14, %v1382_v13 }
 0x1ec   : > { %2717 = vmatpush1.bf16.msra.mxu1 %v2716_v20  ;;  %v2808_v20 = vpack.c.bf16 %v1383_v17, %v1381_v16 }
 0x1ed   : > { %2719 = vmatprep.subr.bf16.mxu1 %v2718_v23 }
 0x1f0   : > { %2721 = vmatpush1.bf16.msra.mxu1 %v2720_v28  ;;  %v1387_v28 = vld [vmem:[%s4231_s7 + $0x4b0] sm:$0xff] }
 0x1f1   : > { %2723 = vmatprep.subr.bf16.mxu1 %v2722_v33  ;;  %v2812_v29 = vpack.c.bf16 %v1387_v28, %v1385_v25  ;;  %v1392_v33 = vld [vmem:[%s4231_s7 + $0x4d8] sm:$0xff] }
 0x1f2   : > { %v2814_v34 = vpack.c.bf16 %v1392_v33, %v1390_v31 }
 0x1f4   : > { %2725 = vmatpush1.bf16.msra.mxu1 %v2724_v36  ;;  %v1391_v36 = vld [vmem:[%s4231_s7 + $0x4d0] sm:$0xff] }
 0x1f5   : > { %2727 = vmatprep.subr.bf16.mxu1 %v2726_v47  ;;  %v2816_v37 = vpack.c.bf16 %v1391_v36, %v1389_v35  ;;  %v1397_v47 = vld [vmem:[%s4231_s7 + $0x500] sm:$0xff] }
 0x21a   : > { %v986_v52 = vpop.permute.xlu1 %985 }
 0x21b   : > { %1009 = vst.msk [vmem:[#allocation4] sm:$0xff] %vm1008_vm12, %v986_v52 }
 0x21e   : > { %v990_v59 = vpop.permute.xlu0 %989  ;;  %v988_v60 = vpop.permute.xlu1 %987 }
 0x21f   : > { %v3450_v4 = vsel %vm306_vm10, %v986_v52, %v988_v60  ;;  %v3453_v61 = vsel %vm306_vm10, %v988_v60, %v990_v59  ;;  %v1374_v52 = vld [vmem:[%s4231_s7 + $0x448] sm:$0xff] }
 0x220   : > { %v3463_v0 = vpack.i.bf16 %v3453_v61, %v3450_v4  ;;  %v2798_v54 = vpack.c.bf16 %v1376_v53, %v1374_v52 }
 0x222   : > { %v3471_v9 = vpop.permute.xlu1 %991  ;;  %v3473_v10 = vld [vmem:[#allocation4] sm:$0xff]  ;;  %2918 = vrot.lane.b32.xlu0 %v3463_v0, %s2996_s11  ;;  %2799 = vmatprep.subr.bf16.mxu0 %v2798_v54 }
 0x223   : > { %v3479_v12 = vsel %vm306_vm10, %v990_v59, %v3471_v9  ;;  %1034 = vrot.lane.b32.xlu1 %v3473_v10, %s2996_s11  ;;  %2801 = vmatpush1.bf16.msra.mxu0 %v2800_v57 }
 0x224   : > { %2803 = vmatprep.subr.bf16.mxu0 %v2802_v2 }
 0x226   : > { %2923 = vrot.lane.b32.xlu0 %v3463_v0, %s2997_s12 }
 0x227   : > { %1063 = vrot.lane.b32.xlu1 %v3473_v10, %s2997_s12 }
 0x22a   : > { %2928 = vrot.lane.b32.xlu0 %v3463_v0, %s2998_s13 }
 0x22b   : > { %1092 = vrot.lane.b32.xlu1 %v3473_v10, %s2998_s13 }
 0x22e   : > { %2933 = vrot.lane.b32.xlu0 %v3463_v0, %s3000_s15 }
 0x22f   : > { %1121 = vrot.lane.b32.xlu1 %v3473_v10, %s3000_s15 }
 0x232   : > { %2938 = vrot.lane.b32.xlu0 %v3463_v0, %s3001_s16 }
 0x233   : > { %1150 = vrot.lane.b32.xlu1 %v3473_v10, %s3001_s16 }
 0x236   : > { %2943 = vrot.lane.b32.xlu0 %v3463_v0, %s3002_s17 }
 0x237   : > { %1179 = vrot.lane.b32.xlu1 %v3473_v10, %s3002_s17 }
 0x23a   : > { %2948 = vrot.lane.b32.xlu0 %v3463_v0, %s3004_s18 }
 0x23b   : > { %v994_v58 = vpop.permute.xlu0 %993  ;;  %1208 = vrot.lane.b32.xlu1 %v3473_v10, %s3004_s18 }
 0x23c   : > { %v3587_v59 = vsel %vm306_vm10, %v3471_v9, %v994_v58  ;;  %v996_v60 = vpop.permute.xlu1 %995  ;;  %v2804_v9 = vpack.c.bf16 %v1379_v6, %v1377_v3 }
 0x23d   : > { %v1001_v0 = vsel %vm306_vm10, %v994_v58, %v996_v60  ;;  %v2952_v1 = vpack.i.bf16 %v3587_v59, %v3479_v12  ;;  %vm1740_vm10 = vcmask 867328  }
 0x23e   : > { %1015 = vst.msk [vmem:[#allocation4 + $0x28] sm:$0xff] %vm1014_vm13, %v1001_v0  ;;  %2805 = vmatpush1.bf16.msra.mxu0 %v2804_v9  ;;  %v1022_v0 = vmax.f32 %v3283_v19, %v3473_v10 }
 0x23f   : > { %2953 = vrot.lane.b32.xlu0 %v2952_v1, %s2996_s11  ;;  %2807 = vmatprep.subr.bf16.mxu0 %v2806_v15 }
 0x242   : > { %2809 = vmatpush1.bf16.msra.mxu0 %v2808_v20 }
 0x243   : > { %2958 = vrot.lane.b32.xlu0 %v2952_v1, %s2997_s12  ;;  %2811 = vmatprep.subr.bf16.mxu0 %v2810_v24 }
 0x245   : > { %v3624_v23 = vld [vmem:[#allocation4 + $0x28] sm:$0xff] }
 0x246   : > { %1044 = vrot.lane.b32.xlu1 %v3624_v23, %s2996_s11  ;;  %2813 = vmatpush1.bf16.msra.mxu0 %v2812_v29 }
 0x247   : > { %2963 = vrot.lane.b32.xlu0 %v2952_v1, %s2998_s13  ;;  %2815 = vmatprep.subr.bf16.mxu0 %v2814_v34 }
 0x24a   : > { %1073 = vrot.lane.b32.xlu1 %v3624_v23, %s2997_s12  ;;  %2817 = vmatpush1.bf16.msra.mxu0 %v2816_v37 }
 0x24b   : > { %2968 = vrot.lane.b32.xlu0 %v2952_v1, %s3000_s15  ;;  %2819 = vmatprep.subr.bf16.mxu0 %v2818_v43 }
 0x24e   : > { %1102 = vrot.lane.b32.xlu1 %v3624_v23, %s2998_s13  ;;  %2821 = vmatpush1.bf16.msra.mxu0 %v2820_v46 }
 0x24f   : > { %2973 = vrot.lane.b32.xlu0 %v2952_v1, %s3001_s16  ;;  %1576 = vmatprep.subr.mxu0 %v1398_v18 }
 0x252   : > { %1131 = vrot.lane.b32.xlu1 %v3624_v23, %s3000_s15  ;;  %1577 = vmatpush1.msra.mxu0 %v1397_v47 }
 0x253   : > { %2978 = vrot.lane.b32.xlu0 %v2952_v1, %s3002_s17 }
 0x256   : > { %1160 = vrot.lane.b32.xlu1 %v3624_v23, %s3001_s16 }
 0x257   : > { %2983 = vrot.lane.b32.xlu0 %v2952_v1, %s3004_s18  ;;  %v1023_v1 = vmax.f32 %v3287_v26, %v3450_v4 }
 0x25a   : > { %1189 = vrot.lane.b32.xlu1 %v3624_v23, %s3002_s17 }
 0x25e   : > { %1218 = vrot.lane.b32.xlu1 %v3624_v23, %s3004_s18 }
 0x294   : > { %v3681_v48 = vpop.permute.xlu0 %2918 }
 0x295   : > { %v1035_v49 = vpop.permute.xlu1 %1034  ;;  %v2921_v51 = vunpack.i.h.bf16 %v3681_v48  ;;  %v2920_v52 = vunpack.i.l.bf16 %v3681_v48  ;;  %v1314_v48 = vld [vmem:[%s4231_s7 + $0x268] sm:$0xff] }
 0x297   : > { %v1046_v57 = vsel %vm353_vm1, %v1035_v49, %v2920_v52  ;;  %v1047_v58 = vsel %vm353_vm1, %v2920_v52, %v2921_v51  ;;  %v1301_v49 = vld [vmem:[%s4231_s7 + $0x200] sm:$0xff] }
 0x298   : > { %v3683_v32 = vpop.permute.xlu0 %2923  ;;  %v1057_v13 = vmax.f32 %v1022_v0, %v1046_v57  ;;  %v1058_v14 = vmax.f32 %v1023_v1, %v1047_v58  ;;  %v1308_v57 = vld [vmem:[%s4231_s7 + $0x238] sm:$0xff] }
 0x299   : > { %v1064_v50 = vpop.permute.xlu1 %1063  ;;  %v2926_v54 = vunpack.i.h.bf16 %v3683_v32  ;;  %v2925_v55 = vunpack.i.l.bf16 %v3683_v32 }
 0x29b   : > { %v1075_v2 = vsel %vm395_vm2, %v1064_v50, %v2925_v55  ;;  %v1076_v3 = vsel %vm395_vm2, %v2925_v55, %v2926_v54  ;;  %v1303_v50 = vld [vmem:[%s4231_s7 + $0x210] sm:$0xff]  ;;  %v1306_v55 = vld [vmem:[%s4231_s7 + $0x228] sm:$0xff] }
 0x29c   : > { %v3685_v40 = vpop.permute.xlu0 %2928  ;;  %v1086_v17 = vmax.f32 %v1057_v13, %v1075_v2  ;;  %v1087_v20 = vmax.f32 %v1058_v14, %v1076_v3  ;;  %v2728_v1 = vpack.c.bf16 %v1303_v50, %v1301_v49  ;;  %v2730_v3 = vpack.c.bf16 %v1308_v57, %v1306_v55  ;;  %v1307_v13 = vld [vmem:[%s4231_s7 + $0x230] sm:$0xff]  ;;  %v1317_v55 = vld [vmem:[%s4231_s7 + $0x280] sm:$0xff] }
 0x29d   : > { %v1093_v53 = vpop.permute.xlu1 %1092  ;;  %v2931_v62 = vunpack.i.h.bf16 %v3685_v40  ;;  %v2930_v63 = vunpack.i.l.bf16 %v3685_v40  ;;  %v1319_v57 = vld [vmem:[%s4231_s7 + $0x290] sm:$0xff] }
 0x29f   : > { %v1104_v16 = vsel %vm437_vm3, %v1093_v53, %v2930_v63  ;;  %v1105_v19 = vsel %vm437_vm3, %v2930_v63, %v2931_v62 }
 0x2a0   : > { %v3691_v56 = vpop.permute.xlu0 %2933  ;;  %v1115_v24 = vmax.f32 %v1086_v17, %v1104_v16  ;;  %v1116_v25 = vmax.f32 %v1087_v20, %v1105_v19  ;;  %v1310_v16 = vld [vmem:[%s4231_s7 + $0x248] sm:$0xff]  ;;  %v1312_v19 = vld [vmem:[%s4231_s7 + $0x258] sm:$0xff] }
 0x2a1   : > { %v1122_v60 = vpop.permute.xlu1 %1121  ;;  %v2936_v6 = vunpack.i.h.bf16 %v3691_v56  ;;  %v2935_v9 = vunpack.i.l.bf16 %v3691_v56  ;;  %v1326_v56 = vld [vmem:[%s4231_s7 + $0x2c8] sm:$0xff] }
 0x2a3   : > { %v1133_v21 = vsel %vm521_vm5, %v1122_v60, %v2935_v9  ;;  %v1134_v22 = vsel %vm521_vm5, %v2935_v9, %v2936_v6  ;;  %v1305_v9 = vld [vmem:[%s4231_s7 + $0x220] sm:$0xff] }
 0x2a4   : > { %v3709_v15 = vpop.permute.xlu0 %2938  ;;  %v1144_v36 = vmax.f32 %v1115_v24, %v1133_v21  ;;  %v1145_v37 = vmax.f32 %v1116_v25, %v1134_v22  ;;  %v2732_v17 = vpack.c.bf16 %v1307_v13, %v1305_v9  ;;  %v2734_v22 = vpack.c.bf16 %v1312_v19, %v1310_v16  ;;  %v1309_v24 = vld [vmem:[%s4231_s7 + $0x240] sm:$0xff] }
 0x2a5   : > { %v1151_v26 = vpop.permute.xlu1 %1150  ;;  %v2941_v4 = vunpack.i.h.bf16 %v3709_v15  ;;  %v2940_v10 = vunpack.i.l.bf16 %v3709_v15  ;;  %v2744_v13 = vpack.c.bf16 %v1319_v57, %v1317_v55  ;;  %v1329_v55 = vld [vmem:[%s4231_s7 + $0x2e0] sm:$0xff] }
 0x2a7   : > { %v1162_v31 = vsel %vm563_vm6, %v1151_v26, %v2940_v10  ;;  %v1163_v33 = vsel %vm563_vm6, %v2940_v10, %v2941_v4  ;;  %v1024_v26 = vmax.f32 %v3289_v27, %v3453_v61  ;;  %v1311_v27 = vld [vmem:[%s4231_s7 + $0x250] sm:$0xff] }
 0x2a8   : > { %v3721_v28 = vpop.permute.xlu0 %2943  ;;  %v1173_v43 = vmax.f32 %v1144_v36, %v1162_v31  ;;  %v1174_v44 = vmax.f32 %v1145_v37, %v1163_v33  ;;  %v2736_v31 = vpack.c.bf16 %v1311_v27, %v1309_v24  ;;  %v1313_v37 = vld [vmem:[%s4231_s7 + $0x260] sm:$0xff] }
 0x2a9   : > { %v1180_v29 = vpop.permute.xlu1 %1179  ;;  %v2946_v34 = vunpack.i.h.bf16 %v3721_v28  ;;  %v2945_v35 = vunpack.i.l.bf16 %v3721_v28 }
 0x2ab   : > { %v1191_v38 = vsel %vm605_vm7, %v1180_v29, %v2945_v35  ;;  %v1192_v39 = vsel %vm605_vm7, %v2945_v35, %v2946_v34 }
 0x2ac   : > { %v3733_v45 = vpop.permute.xlu0 %2948  ;;  %v1202_v52 = vmax.f32 %v1173_v43, %v1191_v38  ;;  %v1203_v53 = vmax.f32 %v1174_v44, %v1192_v39  ;;  %v1315_v38 = vld [vmem:[%s4231_s7 + $0x270] sm:$0xff]  ;;  %v1320_v43 = vld [vmem:[%s4231_s7 + $0x298] sm:$0xff] }
 0x2ad   : > { %v1209_v46 = vpop.permute.xlu1 %1208  ;;  %v2951_v18 = vunpack.i.h.bf16 %v3733_v45  ;;  %v2950_v47 = vunpack.i.l.bf16 %v3733_v45  ;;  %v2740_v49 = vpack.c.bf16 %v1315_v38, %v1313_v37  ;;  %v1335_v45 = vld [vmem:[%s4231_s7 + $0x310] sm:$0xff] }
 0x2af   : > { %v1220_v58 = vsel %vm647_vm8, %v1209_v46, %v2950_v47  ;;  %v1221_v60 = vsel %vm647_vm8, %v2950_v47, %v2951_v18 }
 0x2b0   : > { %v1231_v63 = vmax.f32 %v1202_v52, %v1220_v58  ;;  %v1232_v0 = vmax.f32 %v1203_v53, %v1221_v60  ;;  %v1322_v60 = vld [vmem:[%s4231_s7 + $0x2a8] sm:$0xff] }
 0x2b1   : > { %v3753_v2 = vpop.permute.xlu0 %2953 }
 0x2b2   : > { %v2955_v14 = vunpack.i.l.bf16 %v3753_v2  ;;  %1466 = vmatprep.mubr.f32.mxu1 %v1232_v0  ;;  %v2956_v39 = vunpack.i.h.bf16 %v3753_v2  ;;  %v1025_v0 = vmax.f32 %v3293_v30, %v3479_v12  ;;  %v1323_v12 = vld [vmem:[%s4231_s7 + $0x2b0] sm:$0xff] }
 0x2b3   : > { %1467 = vmatmul.mubr.f32.vlgmr.msra.gmra.mrb[2].mxu1 %v1231_v63  ;;  %v1324_v63 = vld [vmem:[%s4231_s7 + $0x2b8] sm:$0xff] }
 0x2b4   : > { %v1048_v10 = vsel %vm353_vm1, %v2921_v51, %v2955_v14  ;;  %2729 = vmatpush1.bf16.msra.mxu1 %v2728_v1  ;;  %v1316_v51 = vld [vmem:[%s4231_s7 + $0x278] sm:$0xff]  ;;  %v1049_v58 = vsel %vm353_vm1, %v2955_v14, %v2956_v39  ;;  %v1321_v14 = vld [vmem:[%s4231_s7 + $0x2a0] sm:$0xff]  ;;  %v2746_v30 = vpack.c.bf16 %v1324_v63, %v1322_v60 }
 0x2b5   : > { %v1059_v20 = vmax.f32 %v1024_v26, %v1048_v10  ;;  %v3773_v21 = vpop.permute.xlu0 %2958  ;;  %2731 = vmatprep.subr.bf16.mxu1 %v2730_v3  ;;  %v2738_v36 = vpack.c.bf16 %v1316_v51, %v1314_v48  ;;  %v1060_v16 = vmax.f32 %v1025_v0, %v1049_v58  ;;  %v1336_v60 = vld [vmem:[%s4231_s7 + $0x318] sm:$0xff] }
 0x2b6   : > { %v2960_v61 = vunpack.i.l.bf16 %v3773_v21  ;;  %v2961_v46 = vunpack.i.h.bf16 %v3773_v21  ;;  %v1027_v21 = vmax.f32 %v3301_v42, %v3624_v23  ;;  %v1325_v42 = vld [vmem:[%s4231_s7 + $0x2c0] sm:$0xff] }
 0x2b8   : > { %v1045_v25 = vpop.permute.xlu1 %1044  ;;  %v1077_v29 = vsel %vm395_vm2, %v2926_v54, %v2960_v61  ;;  %2733 = vmatpush1.bf16.msra.mxu1 %v2732_v17  ;;  %v1318_v54 = vld [vmem:[%s4231_s7 + $0x288] sm:$0xff]  ;;  %v1078_v2 = vsel %vm395_vm2, %v2960_v61, %v2961_v46 }
 0x2b9   : > { %v1088_v33 = vmax.f32 %v1059_v20, %v1077_v29  ;;  %v3791_v35 = vpop.permute.xlu0 %2963  ;;  %2735 = vmatprep.subr.bf16.mxu1 %v2734_v22  ;;  %v2742_v53 = vpack.c.bf16 %v1320_v43, %v1318_v54  ;;  %v1026_v22 = vmax.f32 %v3299_v41, %v3587_v59  ;;  %v1050_v24 = vsel %vm353_vm1, %v2956_v39, %v1045_v25  ;;  %v1327_v41 = vld [vmem:[%s4231_s7 + $0x2d0] sm:$0xff] }
 0x2ba   : > { %v2965_v32 = vunpack.i.l.bf16 %v3791_v35  ;;  %v2966_v40 = vunpack.i.h.bf16 %v3791_v35  ;;  %v1089_v27 = vmax.f32 %v1060_v16, %v1078_v2  ;;  %v2748_v29 = vpack.c.bf16 %v1323_v12, %v1321_v14 }
 0x2bb   : > { %v1062_v59 = vmax.f32 %v1027_v21, %v1045_v25  ;;  %v1061_v37 = vmax.f32 %v1026_v22, %v1050_v24  ;;  %v1340_v21 = vld [vmem:[%s4231_s7 + $0x338] sm:$0xff] }
 0x2bc   : > { %v3807_v44 = vpop.permute.xlu1 %1073  ;;  %v1106_v47 = vsel %vm437_vm3, %v2931_v62, %v2965_v32  ;;  %2737 = vmatpush1.bf16.msra.mxu1 %v2736_v31  ;;  %v1107_v10 = vsel %vm437_vm3, %v2965_v32, %v2966_v40 }
 0x2bd   : > { %v1117_v50 = vmax.f32 %v1088_v33, %v1106_v47  ;;  %v3813_v52 = vpop.permute.xlu0 %2968  ;;  %2739 = vmatprep.subr.bf16.mxu1 %v2738_v36  ;;  %v1079_v23 = vsel %vm395_vm2, %v2961_v46, %v3807_v44  ;;  %v1118_v33 = vmax.f32 %v1089_v27, %v1107_v10  ;;  %v1332_v36 = vld [vmem:[%s4231_s7 + $0x2f8] sm:$0xff]  ;;  %v1091_v32 = vmax.f32 %v1062_v59, %v3807_v44  ;;  %v1331_v44 = vld [vmem:[%s4231_s7 + $0x2f0] sm:$0xff]  ;;  %v1342_v59 = vld [vmem:[%s4231_s7 + $0x348] sm:$0xff] }
 0x2be   : > { %v2970_v62 = vunpack.i.l.bf16 %v3813_v52  ;;  %v2971_v3 = vunpack.i.h.bf16 %v3813_v52  ;;  %v2752_v46 = vpack.c.bf16 %v1327_v41, %v1325_v42  ;;  %v1090_v47 = vmax.f32 %v1061_v37, %v1079_v23  ;;  %v1339_v42 = vld [vmem:[%s4231_s7 + $0x330] sm:$0xff]  ;;  %v1344_v23 = vld [vmem:[%s4231_s7 + $0x358] sm:$0xff] }
 0x2bf   : > { %v1348_v37 = vld [vmem:[%s4231_s7 + $0x378] sm:$0xff] }
 0x2c0   : > { %v1103_v1 = vpop.permute.xlu1 %1102  ;;  %v1135_v9 = vsel %vm521_vm5, %v2936_v6, %v2970_v62  ;;  %2741 = vmatpush1.bf16.msra.mxu1 %v2740_v49  ;;  %v1328_v6 = vld [vmem:[%s4231_s7 + $0x2d8] sm:$0xff]  ;;  %v1136_v48 = vsel %vm521_vm5, %v2970_v62, %v2971_v3 }
 0x2c1   : > { %v1146_v19 = vmax.f32 %v1117_v50, %v1135_v9  ;;  %v2974_v26 = vpop.permute.xlu0 %2973  ;;  %2743 = vmatprep.subr.bf16.mxu1 %v2742_v53  ;;  %v2750_v31 = vpack.c.bf16 %v1328_v6, %v1326_v56  ;;  %v1108_v54 = vsel %vm437_vm3, %v2966_v40, %v1103_v1  ;;  %v1147_v43 = vmax.f32 %v1118_v33, %v1136_v48 }
 0x2c2   : > { %v2976_v17 = vunpack.i.h.bf16 %v2974_v26  ;;  %v2975_v20 = vunpack.i.l.bf16 %v2974_v26  ;;  %v1120_v57 = vmax.f32 %v1091_v32, %v1103_v1  ;;  %v1119_v63 = vmax.f32 %v1090_v47, %v1108_v54  ;;  %v1347_v32 = vld [vmem:[%s4231_s7 + $0x370] sm:$0xff]  ;;  %v1350_v54 = vld [vmem:[%s4231_s7 + $0x388] sm:$0xff] }
 0x2c3   : > { %vm1629_vm3 = vcmask 678912  }
 0x2c4   : > { %v1132_v61 = vpop.permute.xlu1 %1131  ;;  %v1164_v51 = vsel %vm563_vm6, %v2941_v4, %v2975_v20  ;;  %2745 = vmatpush1.bf16.msra.mxu1 %v2744_v13  ;;  %v1330_v4 = vld [vmem:[%s4231_s7 + $0x2e8] sm:$0xff]  ;;  %v1165_v38 = vsel %vm563_vm6, %v2975_v20, %v2976_v17 }
 0x2c5   : > { %v1175_v35 = vmax.f32 %v1146_v19, %v1164_v51  ;;  %v2979_v15 = vpop.permute.xlu0 %2978  ;;  %2747 = vmatprep.subr.bf16.mxu1 %v2746_v30  ;;  %v2754_v53 = vpack.c.bf16 %v1332_v36, %v1330_v4  ;;  %v1137_v58 = vsel %vm521_vm5, %v2971_v3, %v1132_v61  ;;  %v1176_v40 = vmax.f32 %v1147_v43, %v1165_v38  ;;  %v1338_v20 = vld [vmem:[%s4231_s7 + $0x328] sm:$0xff]  ;;  %v1343_v4 = vld [vmem:[%s4231_s7 + $0x350] sm:$0xff]  ;;  %v1352_v43 = vld [vmem:[%s4231_s7 + $0x398] sm:$0xff] }
 0x2c6   : > { %v2981_v39 = vunpack.i.h.bf16 %v2979_v15  ;;  %v2980_v25 = vunpack.i.l.bf16 %v2979_v15  ;;  %v1149_v9 = vmax.f32 %v1120_v57, %v1132_v61  ;;  %v2756_v3 = vpack.c.bf16 %v1331_v44, %v1329_v55  ;;  %v1341_v15 = vld [vmem:[%s4231_s7 + $0x340] sm:$0xff]  ;;  %v1346_v36 = vld [vmem:[%s4231_s7 + $0x368] sm:$0xff] }
 0x2c7   : > { %v1148_v14 = vmax.f32 %v1119_v63, %v1137_v58  ;;  %v2768_v38 = vpack.c.bf16 %v1343_v4, %v1341_v15  ;;  %v2774_v47 = vpack.c.bf16 %v1352_v43, %v1350_v54  ;;  %v1353_v57 = vld [vmem:[%s4231_s7 + $0x3a0] sm:$0xff]  ;;  %v1355_v58 = vld [vmem:[%s4231_s7 + $0x3b0] sm:$0xff] }
 0x2c8   : > { %v1161_v49 = vpop.permute.xlu1 %1160  ;;  %v1193_v50 = vsel %vm605_vm7, %v2946_v34, %v2980_v25  ;;  %v1194_v52 = vsel %vm605_vm7, %v2980_v25, %v2981_v39  ;;  %2749 = vmatpush1.bf16.msra.mxu1 %v2748_v29  ;;  %v1334_v34 = vld [vmem:[%s4231_s7 + $0x308] sm:$0xff]  ;;  %v2762_v29 = vpack.c.bf16 %v1340_v21, %v1338_v20  ;;  %v1345_v25 = vld [vmem:[%s4231_s7 + $0x360] sm:$0xff]  ;;  %v1359_v63 = vld [vmem:[%s4231_s7 + $0x3d0] sm:$0xff] }
 0x2c9   : > { %v1204_v62 = vmax.f32 %v1175_v35, %v1193_v50  ;;  %v2984_v28 = vpop.permute.xlu0 %2983  ;;  %2751 = vmatprep.subr.bf16.mxu1 %v2750_v31  ;;  %v1166_v1 = vsel %vm563_vm6, %v2976_v17, %v1161_v49  ;;  %v1205_v13 = vmax.f32 %v1176_v40, %v1194_v52  ;;  %v2758_v30 = vpack.c.bf16 %v1336_v60, %v1334_v34  ;;  %v1333_v17 = vld [vmem:[%s4231_s7 + $0x300] sm:$0xff]  ;;  %v1351_v50 = vld [vmem:[%s4231_s7 + $0x390] sm:$0xff]  ;;  %v1354_v52 = vld [vmem:[%s4231_s7 + $0x3a8] sm:$0xff] }
 0x2ca   : > { %v2986_v0 = vunpack.i.h.bf16 %v2984_v28  ;;  %v2985_v2 = vunpack.i.l.bf16 %v2984_v28  ;;  %v1178_v12 = vmax.f32 %v1149_v9, %v1161_v49  ;;  %v2760_v61 = vpack.c.bf16 %v1335_v45, %v1333_v17  ;;  %v1337_v31 = vld [vmem:[%s4231_s7 + $0x320] sm:$0xff]  ;;  %v1358_v40 = vld [vmem:[%s4231_s7 + $0x3c8] sm:$0xff] }
 0x2cb   : > { %v2764_v33 = vpack.c.bf16 %v1339_v42, %v1337_v31  ;;  %v2766_v35 = vpack.c.bf16 %v1344_v23, %v1342_v59  ;;  %v1349_v49 = vld [vmem:[%s4231_s7 + $0x380] sm:$0xff]  ;;  %v2780_v28 = vpack.c.bf16 %v1355_v58, %v1353_v57  ;;  %vm1699_vm6 = vcmask 949248  }
 0x2cc   : > { %v1190_v16 = vpop.permute.xlu1 %1189  ;;  %v1222_v19 = vsel %vm647_vm8, %v2951_v18, %v2985_v2  ;;  %2753 = vmatpush1.bf16.msra.mxu1 %v2752_v46  ;;  %v1223_v26 = vsel %vm647_vm8, %v2985_v2, %v2986_v0  ;;  %v1177_v18 = vmax.f32 %v1148_v14, %v1166_v1  ;;  %v2772_v46 = vpack.c.bf16 %v1347_v32, %v1345_v25  ;;  %v1357_v60 = vld [vmem:[%s4231_s7 + $0x3c0] sm:$0xff]  ;;  %v1364_v2 = vld [vmem:[%s4231_s7 + $0x3f8] sm:$0xff] }
 0x2cd   : > { %v1195_v56 = vsel %vm605_vm7, %v2981_v39, %v1190_v16  ;;  %v3899_v6 = vmax.f32 %v1204_v62, %v1222_v19  ;;  %2755 = vmatprep.subr.bf16.mxu1 %v2754_v53  ;;  %v1234_v10 = vmax.f32 %v1205_v13, %v1223_v26  ;;  %v1207_v22 = vmax.f32 %v1178_v12, %v1190_v16  ;;  %v1356_v53 = vld [vmem:[%s4231_s7 + $0x3b8] sm:$0xff]  ;;  %v1361_v13 = vld [vmem:[%s4231_s7 + $0x3e0] sm:$0xff] }
 0x2ce   : > { %v1206_v27 = vmax.f32 %v1177_v18, %v1195_v56  ;;  %v2770_v39 = vpack.c.bf16 %v1348_v37, %v1346_v36  ;;  %v2776_v55 = vpack.c.bf16 %v1351_v50, %v1349_v49  ;;  %v2778_v44 = vpack.c.bf16 %v1356_v53, %v1354_v52  ;;  %v1360_v62 = vld [vmem:[%s4231_s7 + $0x3d8] sm:$0xff] }
 0x2cf   : > { %1537 = vmatprep.mubr.f32.mxu1 %v1234_v10  ;;  %v2782_v34 = vpack.c.bf16 %v1360_v62, %v1358_v40  ;;  %v2784_v9 = vpack.c.bf16 %v1359_v63, %v1357_v60  ;;  %vm1685_vm7 = vcmask 957440  }
 0x2d0   : > { %v1219_v24 = vpop.permute.xlu1 %1218  ;;  %2757 = vmatpush1.bf16.msra.mxu1 %v2756_v3  ;;  %v1363_v3 = vld [vmem:[%s4231_s7 + $0x3f0] sm:$0xff] }
 0x2d1   : > { %v1236_v48 = vmax.f32 %v1207_v22, %v1219_v24  ;;  %v1224_v51 = vsel %vm647_vm8, %v2986_v0, %v1219_v24  ;;  %2759 = vmatprep.subr.bf16.mxu1 %v2758_v30  ;;  %v1362_v0 = vld [vmem:[%s4231_s7 + $0x3e8] sm:$0xff]  ;;  %v2788_v14 = vpack.c.bf16 %v1363_v3, %v1361_v13  ;;  %v1632_v22 = vld [vmem:[%s4228_s4] sm:$0xff]  ;;  %vm1726_vm8 = vcmask 875520  }
 0x2d2   : > { %v1235_v41 = vmax.f32 %v1206_v27, %v1224_v51  ;;  %v2786_v1 = vpack.c.bf16 %v1364_v2, %v1362_v0  ;;  %v1631_v2 = vld [vmem:[%s4227_s3] sm:$0xff] }
 0x2d3   : > { %2600 = vmatprep.mubr.msk.f32.mxu0 %vm327_vm0, %v1236_v48  ;;  %vm1627_vm0 = vcmask 1047640  }
 0x2d4   : > { %1609 = vmatmul.mubr.f32.vlgmr.msra.gmra.mrb[4].mxu0 %v1235_v41  ;;  %2761 = vmatpush1.bf16.msra.mxu1 %v2760_v61 }
 0x2d5   : > { %2763 = vmatprep.subr.bf16.mxu1 %v2762_v29  ;;  %1836 = vmatprep.mubr.f32.mxu0 %v3003_v5 }
 0x2d8   : > { %2765 = vmatpush1.bf16.msra.mxu1 %v2764_v33 }
 0x2d9   : > { %2767 = vmatprep.subr.bf16.mxu1 %v2766_v35 }
 0x2dc   : > { %2769 = vmatpush1.bf16.msra.mxu1 %v2768_v38 }
 0x2dd   : > { %2771 = vmatprep.subr.bf16.mxu1 %v2770_v39 }
 0x2e0   : > { %2773 = vmatpush1.bf16.msra.mxu1 %v2772_v46 }
 0x2e1   : > { %2775 = vmatprep.subr.bf16.mxu1 %v2774_v47 }
 0x2e4   : > { %2777 = vmatpush1.bf16.msra.mxu1 %v2776_v55 }
 0x2e5   : > { %2779 = vmatprep.subr.bf16.mxu1 %v2778_v44 }
 0x2e8   : > { %2781 = vmatpush1.bf16.msra.mxu1 %v2780_v28 }
 0x2e9   : > { %2783 = vmatprep.subr.bf16.mxu1 %v2782_v34 }
 0x2ec   : > { %2785 = vmatpush1.bf16.msra.mxu1 %v2784_v9 }
 0x2ed   : > { %2787 = vmatprep.subr.bf16.mxu1 %v2786_v1  ;;  %v1615_v1 = vld [vmem:[%s4230_s6] sm:$0x3] }
 0x2ee   : > { %v4055_v13 = vrot.slane %v1615_v1, %v945_v8  ;;  %v4059_v3 = vrot.slane %v1615_v1, %v949_v11 }
 0x2f0   : > { %2789 = vmatpush1.bf16.msra.mxu1 %v2788_v14 }
 0x2f3   : > { %1538 = vmatmul.mubr.f32.vlgmr.msra.gmra.mrb[2].mxu1 %v3899_v6 }
 0x3a7   : > { %v1610_v16 = vpop.f32.mrb[4].mxu0 }
 0x3a8   : > { %v1612_v19 = vpop.f32.mrb[5].mxu0 }
 0x3c6   : > { %v1539_v26 = vpop.f32.mrb[2].mxu1 }
 0x3c7   : > { %v3998_v30 = vadd.f32 %v1610_v16, %v1539_v26  ;;  %v1541_v12 = vpop.f32.mrb[3].mxu1 }
 0x3c8   : > { %v4000_v56 = vadd.f32 %v1612_v19, %v1541_v12 }
 0x3c9   : > { %v1616_v10 = vmax.f32 %v3998_v30, 0.0 }
 0x3ca   : > { %v1617_v17 = vmax.f32 %v4000_v56, 0.0 }
 0x3cb   : > { %1620 = vrot.lane.b32.xlu0 %v1616_v10, %s3007_s19 }
 0x3cc   : > { %1622 = vrot.lane.b32.xlu1 %v1617_v17, %s3007_s19 }
 0x43d   : > { %v1621_v6 = vpop.permute.xlu0 %1620 }
 0x43e   : > { %1628 = vst.msk [vmem:[#allocation5] sm:$0xff] %vm1627_vm0, %v1621_v6  ;;  %v1623_v45 = vpop.permute.xlu1 %1622 }
 0x43f   : > { %v1624_v18 = vsel %vm310_vm14, %v1621_v6, %v1623_v45 }
 0x440   : > { %1630 = vst.msk [vmem:[#allocation5 + $0x8] sm:$0xff] %vm1629_vm3, %v1624_v18 }
 0x445   : > { %v1633_v20 = vld [vmem:[#allocation5] sm:$0xff] }
 0x446   : > { %1641 = vrot.lane.b32.xlu0 %v1633_v20, %s2996_s11 }
 0x447   : > { %v1634_v21 = vld [vmem:[#allocation5 + $0x8] sm:$0xff] }
 0x448   : > { %1636 = vst.msk [vmem:[#allocation3 + $0x8] sm:$0xff] %vm724_vm9, %v1634_v21  ;;  %1643 = vrot.lane.b32.xlu1 %v1634_v21, %s2996_s11 }
 0x44a   : > { %1654 = vrot.lane.b32.xlu0 %v1633_v20, %s2997_s12 }
 0x44c   : > { %1656 = vrot.lane.b32.xlu1 %v1634_v21, %s2997_s12 }
 0x44e   : > { %1667 = vrot.lane.b32.xlu0 %v1633_v20, %s3008_s20 }
 0x44f   : > { %v1747_v42 = vld [vmem:[#allocation3 + $0x8] sm:$0xff] }
 0x450   : > { %1669 = vrot.lane.b32.xlu1 %v1634_v21, %s3008_s20 }
 0x452   : > { %1681 = vrot.lane.b32.xlu0 %v1633_v20, %s3009_s21 }
 0x454   : > { %1683 = vrot.lane.b32.xlu1 %v1634_v21, %s3009_s21 }
 0x456   : > { %1695 = vrot.lane.b32.xlu0 %v1633_v20, %s3010_s22 }
 0x458   : > { %1697 = vrot.lane.b32.xlu1 %v1634_v21, %s3010_s22 }
 0x45a   : > { %1709 = vrot.lane.b32.xlu0 %v1633_v20, %s3000_s15 }
 0x45c   : > { %1711 = vrot.lane.b32.xlu1 %v1634_v21, %s3000_s15 }
 0x45e   : > { %1722 = vrot.lane.b32.xlu0 %v1633_v20, %s3011_s23 }
 0x460   : > { %1724 = vrot.lane.b32.xlu1 %v1634_v21, %s3011_s23 }
 0x462   : > { %1736 = vrot.lane.b32.xlu0 %v1633_v20, %s3012_s24 }
 0x464   : > { %1738 = vrot.lane.b32.xlu1 %v1634_v21, %s3012_s24  ;;  %v2603_v21 = vld [vmem:[%s4228_s4 + $0x8] sm:$0xff] }
 0x466   : > { %1766 = vperm.xlu0 %2916, %v1632_v22  }
 0x4b8   : > { %v1642_v24 = vpop.permute.xlu0 %1641 }
 0x4ba   : > { %v1644_v27 = vpop.permute.xlu1 %1643 }
 0x4bb   : > { %1649 = vst.msk [vmem:[#allocation3 + $0x18] sm:$0xff] %vm724_vm9, %v1644_v27  ;;  %v1645_v29 = vsel %vm353_vm1, %v1642_v24, %v1644_v27 }
 0x4bc   : > { %v1655_v61 = vpop.permute.xlu0 %1654  ;;  %v2824_v23 = vpack.c.bf16 %v1645_v29, %v1633_v20 }
 0x4be   : > { %v1657_v48 = vpop.permute.xlu1 %1656 }
 0x4bf   : > { %1662 = vst.msk [vmem:[#allocation3 + $0x28] sm:$0xff] %vm724_vm9, %v1657_v48  ;;  %v1658_v38 = vsel %vm395_vm2, %v1655_v61, %v1657_v48 }
 0x4c0   : > { %v1668_v51 = vpop.permute.xlu0 %1667 }
 0x4c2   : > { %v1670_v31 = vpop.permute.xlu1 %1669  ;;  %v1749_v41 = vld [vmem:[#allocation3 + $0x18] sm:$0xff] }
 0x4c3   : > { %1676 = vst.msk [vmem:[#allocation3 + $0x38] sm:$0xff] %vm724_vm9, %v1670_v31  ;;  %v2822_v59 = vpack.c.bf16 %v1749_v41, %v1747_v42  ;;  %v1672_v15 = vsel %vm1671_vm4, %v1668_v51, %v1670_v31 }
 0x4c4   : > { %v1682_v33 = vpop.permute.xlu0 %1681  ;;  %v2828_v32 = vpack.c.bf16 %v1672_v15, %v1658_v38 }
 0x4c5   : > { %2823 = vmatprep.subr.bf16.mxu0 %v2822_v59 }
 0x4c6   : > { %v1684_v35 = vpop.permute.xlu1 %1683  ;;  %2825 = vmatpush1.bf16.msra.mxu0 %v2824_v23  ;;  %v1751_v36 = vld [vmem:[#allocation3 + $0x28] sm:$0xff] }
 0x4c7   : > { %1690 = vst.msk [vmem:[#allocation3 + $0x48] sm:$0xff] %vm724_vm9, %v1684_v35  ;;  %v1686_v52 = vsel %vm1685_vm7, %v1682_v33, %v1684_v35 }
 0x4c8   : > { %v1696_v25 = vpop.permute.xlu0 %1695 }
 0x4ca   : > { %v1698_v4 = vpop.permute.xlu1 %1697  ;;  %v1753_v37 = vld [vmem:[#allocation3 + $0x38] sm:$0xff] }
 0x4cb   : > { %1704 = vst.msk [vmem:[#allocation3 + $0x58] sm:$0xff] %vm724_vm9, %v1698_v4  ;;  %v2826_v39 = vpack.c.bf16 %v1753_v37, %v1751_v36  ;;  %v1700_v43 = vsel %vm1699_vm6, %v1696_v25, %v1698_v4 }
 0x4cc   : > { %v1710_v46 = vpop.permute.xlu0 %1709  ;;  %v2832_v55 = vpack.c.bf16 %v1700_v43, %v1686_v52 }
 0x4cd   : > { %2827 = vmatprep.subr.bf16.mxu0 %v2826_v39 }
 0x4ce   : > { %v1712_v54 = vpop.permute.xlu1 %1711  ;;  %2829 = vmatpush1.bf16.msra.mxu0 %v2828_v32  ;;  %v1755_v49 = vld [vmem:[#allocation3 + $0x48] sm:$0xff] }
 0x4cf   : > { %1717 = vst.msk [vmem:[#allocation3 + $0x68] sm:$0xff] %vm724_vm9, %v1712_v54  ;;  %v1713_v28 = vsel %vm521_vm5, %v1710_v46, %v1712_v54 }
 0x4d0   : > { %v1723_v57 = vpop.permute.xlu0 %1722 }
 0x4d2   : > { %v1725_v47 = vpop.permute.xlu1 %1724  ;;  %v1757_v50 = vld [vmem:[#allocation3 + $0x58] sm:$0xff] }
 0x4d3   : > { %1731 = vst.msk [vmem:[#allocation3 + $0x78] sm:$0xff] %vm724_vm9, %v1725_v47  ;;  %v2830_v53 = vpack.c.bf16 %v1757_v50, %v1755_v49  ;;  %v1727_v58 = vsel %vm1726_vm8, %v1723_v57, %v1725_v47 }
 0x4d4   : > { %v2836_v60 = vpack.c.bf16 %v1727_v58, %v1713_v28  ;;  %v1737_v0 = vpop.permute.xlu0 %1736 }
 0x4d5   : > { %2831 = vmatprep.subr.bf16.mxu0 %v2830_v53 }
 0x4d6   : > { %v1739_v44 = vpop.permute.xlu1 %1738  ;;  %2833 = vmatpush1.bf16.msra.mxu0 %v2832_v55  ;;  %v1759_v40 = vld [vmem:[#allocation3 + $0x68] sm:$0xff] }
 0x4d7   : > { %1745 = vst.msk [vmem:[#allocation3 + $0x88] sm:$0xff] %vm724_vm9, %v1739_v44  ;;  %v1741_v9 = vsel %vm1740_vm10, %v1737_v0, %v1739_v44  ;;  %v2602_v0 = vld [vmem:[%s4227_s3 + $0x8] sm:$0xff] }
 0x4da   : > { %v1761_v62 = vld [vmem:[#allocation3 + $0x78] sm:$0xff] }
 0x4db   : > { %v2834_v34 = vpack.c.bf16 %v1761_v62, %v1759_v40 }
 0x4dd   : > { %2835 = vmatprep.subr.bf16.mxu0 %v2834_v34 }
 0x4de   : > { %2837 = vmatpush1.bf16.msra.mxu0 %v2836_v60  ;;  %v1763_v63 = vld [vmem:[#allocation3 + $0x88] sm:$0xff] }
 0x4df   : > { %1788 = vmatprep.subr.mxu0 %v1763_v63 }
 0x4e2   : > { %1789 = vmatpush1.msra.mxu0 %v1741_v9 }
 0x4e3   : > { %2601 = vmatmul.mubr.msk.f32.vlgmr.msra.gmra.mrb[6].mxu0 %vm724_vm9, %v1631_v2 }
 0x4e4   : > { %2071 = vmatprep.mubr.f32.mxu0 %v3003_v5 }
 0x4e5   : > { %v1767_v14 = vpop.permute.xlu0 %1766 }
 0x5b6   : > { %v1838_v16 = vpop.f32.mrb[6].mxu0 }
 0x5b7   : > { %v1839_v19 = vadd.f32 %v1838_v16, %v1767_v14  ;;  %v1840_v26 = vpop.f32.mrb[7].mxu0 }
 0x5b8   : > { %v1841_v12 = vadd.f32 %v1840_v26, %v1767_v14 }
 0x5b9   : > { %v1854_v10 = vmul.f32 %v4055_v13, %v1839_v19 }
 0x5ba   : > { %v1855_v17 = vmul.f32 %v4059_v3, %v1841_v12 }
 0x5bb   : > { %v1856_v6 = vmax.f32 %v1854_v10, 0.0 }
 0x5bc   : > { %v1857_v45 = vmax.f32 %v1855_v17, 0.0 }
 0x5bd   : > { %1860 = vrot.lane.b32.xlu1 %v1856_v6, %s3007_s19 }
 0x5be   : > { %1862 = vrot.lane.b32.xlu0 %v1857_v45, %s3007_s19 }
 0x62f   : > { %v1861_v8 = vpop.permute.xlu1 %1860 }
 0x630   : > { %1867 = vst.msk [vmem:[#allocation5] sm:$0xff] %vm1627_vm0, %v1861_v8  ;;  %v1863_v7 = vpop.permute.xlu0 %1862 }
 0x631   : > { %v1864_v11 = vsel %vm310_vm14, %v1861_v8, %v1863_v7 }
 0x632   : > { %1868 = vst.msk [vmem:[#allocation5 + $0x8] sm:$0xff] %vm1629_vm3, %v1864_v11 }
 0x637   : > { %v1877_v18 = vld [vmem:[#allocation5] sm:$0xff] }
 0x638   : > { %1881 = vrot.lane.b32.xlu1 %v1877_v18, %s2996_s11 }
 0x639   : > { %v1878_v20 = vld [vmem:[#allocation5 + $0x8] sm:$0xff] }
 0x63a   : > { %1883 = vrot.lane.b32.xlu0 %v1878_v20, %s2996_s11  ;;  %1876 = vst.msk [vmem:[#allocation3 + $0x8] sm:$0xff] %vm724_vm9, %v1878_v20 }
 0x63c   : > { %1894 = vrot.lane.b32.xlu1 %v1877_v18, %s2997_s12 }
 0x63e   : > { %1896 = vrot.lane.b32.xlu0 %v1878_v20, %s2997_s12 }
 0x640   : > { %1907 = vrot.lane.b32.xlu1 %v1877_v18, %s3008_s20 }
 0x641   : > { %v1982_v31 = vld [vmem:[#allocation3 + $0x8] sm:$0xff] }
 0x642   : > { %1909 = vrot.lane.b32.xlu0 %v1878_v20, %s3008_s20 }
 0x644   : > { %1920 = vrot.lane.b32.xlu1 %v1877_v18, %s3009_s21 }
 0x646   : > { %1922 = vrot.lane.b32.xlu0 %v1878_v20, %s3009_s21 }
 0x648   : > { %1933 = vrot.lane.b32.xlu1 %v1877_v18, %s3010_s22 }
 0x64a   : > { %1935 = vrot.lane.b32.xlu0 %v1878_v20, %s3010_s22 }
 0x64c   : > { %1946 = vrot.lane.b32.xlu1 %v1877_v18, %s3000_s15 }
 0x64e   : > { %1948 = vrot.lane.b32.xlu0 %v1878_v20, %s3000_s15 }
 0x650   : > { %1959 = vrot.lane.b32.xlu1 %v1877_v18, %s3011_s23 }
 0x652   : > { %1961 = vrot.lane.b32.xlu0 %v1878_v20, %s3011_s23 }
 0x654   : > { %1972 = vrot.lane.b32.xlu1 %v1877_v18, %s3012_s24 }
 0x656   : > { %1974 = vrot.lane.b32.xlu0 %v1878_v20, %s3012_s24 }
 0x658   : > { %2001 = vperm.xlu1 %2987, %v2603_v21  }
 0x6aa   : > { %v1882_v22 = vpop.permute.xlu1 %1881 }
 0x6ac   : > { %v1884_v24 = vpop.permute.xlu0 %1883 }
 0x6ad   : > { %1889 = vst.msk [vmem:[#allocation3 + $0x18] sm:$0xff] %vm724_vm9, %v1884_v24  ;;  %v1885_v51 = vsel %vm353_vm1, %v1882_v22, %v1884_v24 }
 0x6ae   : > { %v1895_v27 = vpop.permute.xlu1 %1894  ;;  %v2840_v59 = vpack.c.bf16 %v1885_v51, %v1877_v18  ;;  %v2606_v18 = vld [vmem:[%s4228_s4 + $0x10] sm:$0xff] }
 0x6b0   : > { %v1897_v61 = vpop.permute.xlu0 %1896 }
 0x6b1   : > { %1902 = vst.msk [vmem:[#allocation3 + $0x28] sm:$0xff] %vm724_vm9, %v1897_v61  ;;  %v1898_v37 = vsel %vm395_vm2, %v1895_v27, %v1897_v61 }
 0x6b2   : > { %v1908_v48 = vpop.permute.xlu1 %1907 }
 0x6b4   : > { %v1910_v29 = vpop.permute.xlu0 %1909  ;;  %v1984_v42 = vld [vmem:[#allocation3 + $0x18] sm:$0xff] }
 0x6b5   : > { %1915 = vst.msk [vmem:[#allocation3 + $0x38] sm:$0xff] %vm724_vm9, %v1910_v29  ;;  %v2838_v41 = vpack.c.bf16 %v1984_v42, %v1982_v31  ;;  %v1911_v35 = vsel %vm1671_vm4, %v1908_v48, %v1910_v29 }
 0x6b6   : > { %v1921_v23 = vpop.permute.xlu1 %1920  ;;  %v2844_v25 = vpack.c.bf16 %v1911_v35, %v1898_v37 }
 0x6b7   : > { %2839 = vmatprep.subr.bf16.mxu0 %v2838_v41 }
 0x6b8   : > { %v1923_v33 = vpop.permute.xlu0 %1922  ;;  %2841 = vmatpush1.bf16.msra.mxu0 %v2840_v59  ;;  %v1986_v4 = vld [vmem:[#allocation3 + $0x28] sm:$0xff] }
 0x6b9   : > { %1928 = vst.msk [vmem:[#allocation3 + $0x48] sm:$0xff] %vm724_vm9, %v1923_v33  ;;  %v1924_v50 = vsel %vm1685_vm7, %v1921_v23, %v1923_v33 }
 0x6ba   : > { %v1934_v39 = vpop.permute.xlu1 %1933 }
 0x6bc   : > { %v1936_v15 = vpop.permute.xlu0 %1935  ;;  %v1988_v36 = vld [vmem:[#allocation3 + $0x38] sm:$0xff] }
 0x6bd   : > { %1941 = vst.msk [vmem:[#allocation3 + $0x58] sm:$0xff] %vm724_vm9, %v1936_v15  ;;  %v2842_v38 = vpack.c.bf16 %v1988_v36, %v1986_v4  ;;  %v1937_v54 = vsel %vm1699_vm6, %v1934_v39, %v1936_v15 }
 0x6be   : > { %v1947_v43 = vpop.permute.xlu1 %1946  ;;  %v2848_v53 = vpack.c.bf16 %v1937_v54, %v1924_v50 }
 0x6bf   : > { %2843 = vmatprep.subr.bf16.mxu0 %v2842_v38 }
 0x6c0   : > { %v1949_v32 = vpop.permute.xlu0 %1948  ;;  %2845 = vmatpush1.bf16.msra.mxu0 %v2844_v25  ;;  %v1990_v47 = vld [vmem:[#allocation3 + $0x48] sm:$0xff] }
 0x6c1   : > { %1954 = vst.msk [vmem:[#allocation3 + $0x68] sm:$0xff] %vm724_vm9, %v1949_v32  ;;  %v1950_v62 = vsel %vm521_vm5, %v1947_v43, %v1949_v32 }
 0x6c2   : > { %v1960_v44 = vpop.permute.xlu1 %1959 }
 0x6c4   : > { %v1962_v46 = vpop.permute.xlu0 %1961  ;;  %v1992_v49 = vld [vmem:[#allocation3 + $0x58] sm:$0xff] }
 0x6c5   : > { %1967 = vst.msk [vmem:[#allocation3 + $0x78] sm:$0xff] %vm724_vm9, %v1962_v46  ;;  %v2846_v52 = vpack.c.bf16 %v1992_v49, %v1990_v47  ;;  %v1963_v57 = vsel %vm1726_vm8, %v1960_v44, %v1962_v46 }
 0x6c6   : > { %v2852_v34 = vpack.c.bf16 %v1963_v57, %v1950_v62  ;;  %v1973_v63 = vpop.permute.xlu1 %1972 }
 0x6c7   : > { %2847 = vmatprep.subr.bf16.mxu0 %v2846_v52 }
 0x6c8   : > { %v1975_v55 = vpop.permute.xlu0 %1974  ;;  %2849 = vmatpush1.bf16.msra.mxu0 %v2848_v53  ;;  %v1994_v58 = vld [vmem:[#allocation3 + $0x68] sm:$0xff] }
 0x6c9   : > { %1980 = vst.msk [vmem:[#allocation3 + $0x88] sm:$0xff] %vm724_vm9, %v1975_v55  ;;  %v1976_v2 = vsel %vm1740_vm10, %v1973_v63, %v1975_v55 }
 0x6cc   : > { %v1996_v40 = vld [vmem:[#allocation3 + $0x78] sm:$0xff] }
 0x6cd   : > { %v2850_v28 = vpack.c.bf16 %v1996_v40, %v1994_v58 }
 0x6cf   : > { %2851 = vmatprep.subr.bf16.mxu0 %v2850_v28 }
 0x6d0   : > { %2853 = vmatpush1.bf16.msra.mxu0 %v2852_v34  ;;  %v1998_v60 = vld [vmem:[#allocation3 + $0x88] sm:$0xff] }
 0x6d1   : > { %2023 = vmatprep.subr.mxu0 %v1998_v60  ;;  %v2605_v60 = vld [vmem:[%s4227_s3 + $0x10] sm:$0xff] }
 0x6d4   : > { %2024 = vmatpush1.msra.mxu0 %v1976_v2 }
 0x6d5   : > { %2604 = vmatmul.mubr.msk.f32.vlgmr.msra.gmra.mrb[8].mxu0 %vm724_vm9, %v2602_v0 }
 0x6d6   : > { %2297 = vmatprep.mubr.f32.mxu0 %v3003_v5 }
 0x6d7   : > { %v2002_v9 = vpop.permute.xlu1 %2001 }
 0x7a8   : > { %v2073_v1 = vpop.f32.mrb[8].mxu0 }
 0x7a9   : > { %v2074_v14 = vadd.f32 %v2073_v1, %v2002_v9  ;;  %v2075_v16 = vpop.f32.mrb[9].mxu0 }
 0x7aa   : > { %v2076_v19 = vadd.f32 %v2075_v16, %v2002_v9 }
 0x7ab   : > { %v2078_v26 = vadd.f32 %v3998_v30, %v2074_v14 }
 0x7ac   : > { %v2079_v12 = vadd.f32 %v4000_v56, %v2076_v19 }
 0x7ad   : > { %v4112_v10 = vmul.f32 %v2078_v26, %v4055_v13 }
 0x7ae   : > { %v4115_v17 = vmul.f32 %v2079_v12, %v4059_v3 }
 0x7af   : > { %v2082_v6 = vmax.f32 %v4112_v10, 0.0 }
 0x7b0   : > { %v2083_v45 = vmax.f32 %v4115_v17, 0.0 }
 0x7b1   : > { %2086 = vrot.lane.b32.xlu0 %v2082_v6, %s3007_s19 }
 0x7b2   : > { %2088 = vrot.lane.b32.xlu1 %v2083_v45, %s3007_s19 }
 0x823   : > { %v2087_v8 = vpop.permute.xlu0 %2086 }
 0x824   : > { %2093 = vst.msk [vmem:[#allocation5] sm:$0xff] %vm1627_vm0, %v2087_v8  ;;  %v2089_v30 = vpop.permute.xlu1 %2088 }
 0x825   : > { %v2090_v56 = vsel %vm310_vm14, %v2087_v8, %v2089_v30 }
 0x826   : > { %2094 = vst.msk [vmem:[#allocation5 + $0x8] sm:$0xff] %vm1629_vm3, %v2090_v56  ;;  %v2609_v56 = vld [vmem:[%s4228_s4 + $0x18] sm:$0xff] }
 0x82b   : > { %v2103_v7 = vld [vmem:[#allocation5] sm:$0xff] }
 0x82c   : > { %2107 = vrot.lane.b32.xlu0 %v2103_v7, %s2996_s11 }
 0x82d   : > { %v2104_v11 = vld [vmem:[#allocation5 + $0x8] sm:$0xff] }
 0x82e   : > { %2109 = vrot.lane.b32.xlu1 %v2104_v11, %s2996_s11  ;;  %2102 = vst.msk [vmem:[#allocation3 + $0x8] sm:$0xff] %vm724_vm9, %v2104_v11 }
 0x830   : > { %2120 = vrot.lane.b32.xlu0 %v2103_v7, %s2997_s12 }
 0x832   : > { %2122 = vrot.lane.b32.xlu1 %v2104_v11, %s2997_s12 }
 0x834   : > { %2133 = vrot.lane.b32.xlu0 %v2103_v7, %s3008_s20 }
 0x835   : > { %v2208_v51 = vld [vmem:[#allocation3 + $0x8] sm:$0xff] }
 0x836   : > { %2135 = vrot.lane.b32.xlu1 %v2104_v11, %s3008_s20 }
 0x838   : > { %2146 = vrot.lane.b32.xlu0 %v2103_v7, %s3009_s21 }
 0x83a   : > { %2148 = vrot.lane.b32.xlu1 %v2104_v11, %s3009_s21 }
 0x83c   : > { %2159 = vrot.lane.b32.xlu0 %v2103_v7, %s3010_s22 }
 0x83e   : > { %2161 = vrot.lane.b32.xlu1 %v2104_v11, %s3010_s22 }
 0x840   : > { %2172 = vrot.lane.b32.xlu0 %v2103_v7, %s3000_s15 }
 0x842   : > { %2174 = vrot.lane.b32.xlu1 %v2104_v11, %s3000_s15 }
 0x844   : > { %2185 = vrot.lane.b32.xlu0 %v2103_v7, %s3011_s23 }
 0x846   : > { %2187 = vrot.lane.b32.xlu1 %v2104_v11, %s3011_s23 }
 0x848   : > { %2198 = vrot.lane.b32.xlu0 %v2103_v7, %s3012_s24 }
 0x84a   : > { %2200 = vrot.lane.b32.xlu1 %v2104_v11, %s3012_s24 }
 0x84c   : > { %2227 = vperm.xlu0 %2916, %v2606_v18  }
 0x89e   : > { %v2108_v20 = vpop.permute.xlu0 %2107 }
 0x8a0   : > { %v2110_v21 = vpop.permute.xlu1 %2109 }
 0x8a1   : > { %2115 = vst.msk [vmem:[#allocation3 + $0x18] sm:$0xff] %vm724_vm9, %v2110_v21  ;;  %v2111_v61 = vsel %vm353_vm1, %v2108_v20, %v2110_v21 }
 0x8a2   : > { %v2121_v22 = vpop.permute.xlu0 %2120  ;;  %v2856_v42 = vpack.c.bf16 %v2111_v61, %v2103_v7 }
 0x8a4   : > { %v2123_v24 = vpop.permute.xlu1 %2122 }
 0x8a5   : > { %2128 = vst.msk [vmem:[#allocation3 + $0x28] sm:$0xff] %vm724_vm9, %v2123_v24  ;;  %v2124_v4 = vsel %vm395_vm2, %v2121_v22, %v2123_v24 }
 0x8a6   : > { %v2134_v27 = vpop.permute.xlu0 %2133 }
 0x8a8   : > { %v2136_v48 = vpop.permute.xlu1 %2135  ;;  %v2210_v29 = vld [vmem:[#allocation3 + $0x18] sm:$0xff] }
 0x8a9   : > { %2141 = vst.msk [vmem:[#allocation3 + $0x38] sm:$0xff] %vm724_vm9, %v2136_v48  ;;  %v2854_v31 = vpack.c.bf16 %v2210_v29, %v2208_v51  ;;  %v2137_v23 = vsel %vm1671_vm4, %v2134_v27, %v2136_v48 }
 0x8aa   : > { %v2147_v41 = vpop.permute.xlu0 %2146  ;;  %v2860_v38 = vpack.c.bf16 %v2137_v23, %v2124_v4 }
 0x8ab   : > { %2855 = vmatprep.subr.bf16.mxu0 %v2854_v31 }
 0x8ac   : > { %v2149_v59 = vpop.permute.xlu1 %2148  ;;  %2857 = vmatpush1.bf16.msra.mxu0 %v2856_v42  ;;  %v2212_v35 = vld [vmem:[#allocation3 + $0x28] sm:$0xff] }
 0x8ad   : > { %2154 = vst.msk [vmem:[#allocation3 + $0x48] sm:$0xff] %vm724_vm9, %v2149_v59  ;;  %v2150_v47 = vsel %vm1685_vm7, %v2147_v41, %v2149_v59 }
 0x8ae   : > { %v2160_v37 = vpop.permute.xlu0 %2159 }
 0x8b0   : > { %v2162_v33 = vpop.permute.xlu1 %2161  ;;  %v2214_v15 = vld [vmem:[#allocation3 + $0x38] sm:$0xff] }
 0x8b1   : > { %2167 = vst.msk [vmem:[#allocation3 + $0x58] sm:$0xff] %vm724_vm9, %v2162_v33  ;;  %v2858_v36 = vpack.c.bf16 %v2214_v15, %v2212_v35  ;;  %v2163_v25 = vsel %vm1699_vm6, %v2160_v37, %v2162_v33 }
 0x8b2   : > { %v2173_v32 = vpop.permute.xlu0 %2172  ;;  %v2864_v50 = vpack.c.bf16 %v2163_v25, %v2150_v47 }
 0x8b3   : > { %2859 = vmatprep.subr.bf16.mxu0 %v2858_v36 }
 0x8b4   : > { %v2175_v39 = vpop.permute.xlu1 %2174  ;;  %2861 = vmatpush1.bf16.msra.mxu0 %v2860_v38  ;;  %v2216_v43 = vld [vmem:[#allocation3 + $0x48] sm:$0xff] }
 0x8b5   : > { %2180 = vst.msk [vmem:[#allocation3 + $0x68] sm:$0xff] %vm724_vm9, %v2175_v39  ;;  %v2176_v58 = vsel %vm521_vm5, %v2173_v32, %v2175_v39 }
 0x8b6   : > { %v2186_v53 = vpop.permute.xlu0 %2185 }
 0x8b8   : > { %v2188_v54 = vpop.permute.xlu1 %2187  ;;  %v2218_v46 = vld [vmem:[#allocation3 + $0x58] sm:$0xff] }
 0x8b9   : > { %2193 = vst.msk [vmem:[#allocation3 + $0x78] sm:$0xff] %vm724_vm9, %v2188_v54  ;;  %v2862_v49 = vpack.c.bf16 %v2218_v46, %v2216_v43  ;;  %v2189_v55 = vsel %vm1726_vm8, %v2186_v53, %v2188_v54 }
 0x8ba   : > { %v2868_v62 = vpack.c.bf16 %v2189_v55, %v2176_v58  ;;  %v2199_v34 = vpop.permute.xlu0 %2198 }
 0x8bb   : > { %2863 = vmatprep.subr.bf16.mxu0 %v2862_v49 }
 0x8bc   : > { %v2201_v52 = vpop.permute.xlu1 %2200  ;;  %2865 = vmatpush1.bf16.msra.mxu0 %v2864_v50  ;;  %v2220_v44 = vld [vmem:[#allocation3 + $0x68] sm:$0xff] }
 0x8bd   : > { %2206 = vst.msk [vmem:[#allocation3 + $0x88] sm:$0xff] %vm724_vm9, %v2201_v52  ;;  %v2202_v63 = vsel %vm1740_vm10, %v2199_v34, %v2201_v52 }
 0x8c0   : > { %v2222_v57 = vld [vmem:[#allocation3 + $0x78] sm:$0xff] }
 0x8c1   : > { %v2866_v40 = vpack.c.bf16 %v2222_v57, %v2220_v44 }
 0x8c3   : > { %2867 = vmatprep.subr.bf16.mxu0 %v2866_v40 }
 0x8c4   : > { %2869 = vmatpush1.bf16.msra.mxu0 %v2868_v62  ;;  %v2224_v28 = vld [vmem:[#allocation3 + $0x88] sm:$0xff] }
 0x8c5   : > { %2249 = vmatprep.subr.mxu0 %v2224_v28  ;;  %v2608_v28 = vld [vmem:[%s4227_s3 + $0x18] sm:$0xff] }
 0x8c8   : > { %2250 = vmatpush1.msra.mxu0 %v2202_v63 }
 0x8c9   : > { %2607 = vmatmul.mubr.msk.f32.vlgmr.msra.gmra.mrb[10].mxu0 %vm724_vm9, %v2605_v60 }
 0x8ca   : > { %2521 = vmatprep.mubr.f32.mxu0 %v3003_v5 }
 0x8cb   : > { %v2228_v0 = vpop.permute.xlu0 %2227 }
 0x99c   : > { %v2299_v2 = vpop.f32.mrb[10].mxu0 }
 0x99d   : > { %v2300_v9 = vadd.f32 %v2299_v2, %v2228_v0  ;;  %v2301_v1 = vpop.f32.mrb[11].mxu0 }
 0x99e   : > { %v2302_v14 = vadd.f32 %v2301_v1, %v2228_v0 }
 0x99f   : > { %v2304_v16 = vmul.f32 %v2300_v9, %v4055_v13 }
 0x9a0   : > { %v2305_v19 = vmul.f32 %v2302_v14, %v4059_v3 }
 0x9a1   : > { %v2306_v26 = vmax.f32 %v2304_v16, 0.0 }
 0x9a2   : > { %v2307_v12 = vmax.f32 %v2305_v19, 0.0 }
 0x9a3   : > { %2310 = vrot.lane.b32.xlu1 %v2306_v26, %s3007_s19 }
 0x9a4   : > { %2312 = vrot.lane.b32.xlu0 %v2307_v12, %s3007_s19 }
 0xa15   : > { %v2311_v6 = vpop.permute.xlu1 %2310 }
 0xa16   : > { %2317 = vst.msk [vmem:[#allocation5] sm:$0xff] %vm1627_vm0, %v2311_v6  ;;  %v2313_v45 = vpop.permute.xlu0 %2312 }
 0xa17   : > { %v2314_v5 = vsel %vm310_vm14, %v2311_v6, %v2313_v45 }
 0xa18   : > { %2318 = vst.msk [vmem:[#allocation5 + $0x8] sm:$0xff] %vm1629_vm3, %v2314_v5 }
 0xa1d   : > { %v2327_v8 = vld [vmem:[#allocation5] sm:$0xff] }
 0xa1e   : > { %2331 = vrot.lane.b32.xlu1 %v2327_v8, %s2996_s11 }
 0xa1f   : > { %v2328_v30 = vld [vmem:[#allocation5 + $0x8] sm:$0xff] }
 0xa20   : > { %2333 = vrot.lane.b32.xlu0 %v2328_v30, %s2996_s11  ;;  %2326 = vst.msk [vmem:[#allocation3 + $0x8] sm:$0xff] %vm724_vm9, %v2328_v30 }
 0xa22   : > { %2344 = vrot.lane.b32.xlu1 %v2327_v8, %s2997_s12 }
 0xa24   : > { %2346 = vrot.lane.b32.xlu0 %v2328_v30, %s2997_s12 }
 0xa26   : > { %2357 = vrot.lane.b32.xlu1 %v2327_v8, %s3008_s20 }
 0xa27   : > { %v2432_v61 = vld [vmem:[#allocation3 + $0x8] sm:$0xff] }
 0xa28   : > { %2359 = vrot.lane.b32.xlu0 %v2328_v30, %s3008_s20  ;;  %s2613_s20 = sshll.u32 %s4234_s28, 4 }
 0xa2a   : > { %2370 = vrot.lane.b32.xlu1 %v2327_v8, %s3009_s21 }
 0xa2c   : > { %2372 = vrot.lane.b32.xlu0 %v2328_v30, %s3009_s21 }
 0xa2e   : > { %2383 = vrot.lane.b32.xlu1 %v2327_v8, %s3010_s22 }
 0xa30   : > { %2385 = vrot.lane.b32.xlu0 %v2328_v30, %s3010_s22 }
 0xa32   : > { %2396 = vrot.lane.b32.xlu1 %v2327_v8, %s3000_s15 }
 0xa34   : > { %2398 = vrot.lane.b32.xlu0 %v2328_v30, %s3000_s15 }
 0xa36   : > { %2409 = vrot.lane.b32.xlu1 %v2327_v8, %s3011_s23 }
 0xa38   : > { %2411 = vrot.lane.b32.xlu0 %v2328_v30, %s3011_s23  ;;  %s305_s23 = scalar_lea.vmem %s4232_s8, %s2613_s20 }
 0xa3a   : > { %2422 = vrot.lane.b32.xlu1 %v2327_v8, %s3012_s24 }
 0xa3c   : > { %2424 = vrot.lane.b32.xlu0 %v2328_v30, %s3012_s24 }
 0xa3e   : > { %2451 = vperm.xlu1 %2987, %v2609_v56  }
 0xa90   : > { %v2332_v7 = vpop.permute.xlu1 %2331 }
 0xa92   : > { %v2334_v11 = vpop.permute.xlu0 %2333 }
 0xa93   : > { %v2335_v18 = vsel %vm353_vm1, %v2332_v7, %v2334_v11  ;;  %2339 = vst.msk [vmem:[#allocation3 + $0x18] sm:$0xff] %vm724_vm9, %v2334_v11 }
 0xa94   : > { %v2345_v20 = vpop.permute.xlu1 %2344  ;;  %v2872_v42 = vpack.c.bf16 %v2335_v18, %v2327_v8 }
 0xa96   : > { %v2347_v21 = vpop.permute.xlu0 %2346 }
 0xa97   : > { %v2348_v22 = vsel %vm395_vm2, %v2345_v20, %v2347_v21  ;;  %2352 = vst.msk [vmem:[#allocation3 + $0x28] sm:$0xff] %vm724_vm9, %v2347_v21 }
 0xa98   : > { %v2358_v24 = vpop.permute.xlu1 %2357 }
 0xa9a   : > { %v2360_v27 = vpop.permute.xlu0 %2359  ;;  %v2434_v48 = vld [vmem:[#allocation3 + $0x18] sm:$0xff] }
 0xa9b   : > { %v2361_v51 = vsel %vm1671_vm4, %v2358_v24, %v2360_v27  ;;  %2365 = vst.msk [vmem:[#allocation3 + $0x38] sm:$0xff] %vm724_vm9, %v2360_v27  ;;  %v2870_v29 = vpack.c.bf16 %v2434_v48, %v2432_v61 }
 0xa9c   : > { %v2371_v31 = vpop.permute.xlu1 %2370  ;;  %v2876_v38 = vpack.c.bf16 %v2361_v51, %v2348_v22 }
 0xa9d   : > { %2871 = vmatprep.subr.bf16.mxu0 %v2870_v29 }
 0xa9e   : > { %v2373_v41 = vpop.permute.xlu0 %2372  ;;  %2873 = vmatpush1.bf16.msra.mxu0 %v2872_v42  ;;  %v2436_v35 = vld [vmem:[#allocation3 + $0x28] sm:$0xff] }
 0xa9f   : > { %v2374_v59 = vsel %vm1685_vm7, %v2371_v31, %v2373_v41  ;;  %2378 = vst.msk [vmem:[#allocation3 + $0x48] sm:$0xff] %vm724_vm9, %v2373_v41 }
 0xaa0   : > { %v2384_v23 = vpop.permute.xlu1 %2383 }
 0xaa2   : > { %v2386_v33 = vpop.permute.xlu0 %2385  ;;  %v2438_v15 = vld [vmem:[#allocation3 + $0x38] sm:$0xff] }
 0xaa3   : > { %v2387_v4 = vsel %vm1699_vm6, %v2384_v23, %v2386_v33  ;;  %2391 = vst.msk [vmem:[#allocation3 + $0x58] sm:$0xff] %vm724_vm9, %v2386_v33  ;;  %v2874_v36 = vpack.c.bf16 %v2438_v15, %v2436_v35 }
 0xaa4   : > { %v2397_v37 = vpop.permute.xlu1 %2396  ;;  %v2880_v50 = vpack.c.bf16 %v2387_v4, %v2374_v59 }
 0xaa5   : > { %2875 = vmatprep.subr.bf16.mxu0 %v2874_v36 }
 0xaa6   : > { %v2399_v39 = vpop.permute.xlu0 %2398  ;;  %2877 = vmatpush1.bf16.msra.mxu0 %v2876_v38  ;;  %v2440_v43 = vld [vmem:[#allocation3 + $0x48] sm:$0xff] }
 0xaa7   : > { %v2400_v25 = vsel %vm521_vm5, %v2397_v37, %v2399_v39  ;;  %2404 = vst.msk [vmem:[#allocation3 + $0x68] sm:$0xff] %vm724_vm9, %v2399_v39 }
 0xaa8   : > { %v2410_v32 = vpop.permute.xlu1 %2409 }
 0xaaa   : > { %v2412_v54 = vpop.permute.xlu0 %2411  ;;  %v2442_v46 = vld [vmem:[#allocation3 + $0x58] sm:$0xff] }
 0xaab   : > { %v2413_v47 = vsel %vm1726_vm8, %v2410_v32, %v2412_v54  ;;  %2417 = vst.msk [vmem:[#allocation3 + $0x78] sm:$0xff] %vm724_vm9, %v2412_v54  ;;  %v2878_v49 = vpack.c.bf16 %v2442_v46, %v2440_v43 }
 0xaac   : > { %v2423_v52 = vpop.permute.xlu1 %2422  ;;  %v2884_v40 = vpack.c.bf16 %v2413_v47, %v2400_v25 }
 0xaad   : > { %2879 = vmatprep.subr.bf16.mxu0 %v2878_v49 }
 0xaae   : > { %v2425_v53 = vpop.permute.xlu0 %2424  ;;  %2881 = vmatpush1.bf16.msra.mxu0 %v2880_v50  ;;  %v2444_v44 = vld [vmem:[#allocation3 + $0x68] sm:$0xff] }
 0xaaf   : > { %v2426_v55 = vsel %vm1740_vm10, %v2423_v52, %v2425_v53  ;;  %2430 = vst.msk [vmem:[#allocation3 + $0x88] sm:$0xff] %vm724_vm9, %v2425_v53 }
 0xab2   : > { %v2446_v57 = vld [vmem:[#allocation3 + $0x78] sm:$0xff] }
 0xab3   : > { %v2882_v58 = vpack.c.bf16 %v2446_v57, %v2444_v44 }
 0xab5   : > { %2883 = vmatprep.subr.bf16.mxu0 %v2882_v58 }
 0xab6   : > { %2885 = vmatpush1.bf16.msra.mxu0 %v2884_v40  ;;  %v2448_v62 = vld [vmem:[#allocation3 + $0x88] sm:$0xff] }
 0xab7   : > { %2473 = vmatprep.subr.mxu0 %v2448_v62 }
 0xaba   : > { %2474 = vmatpush1.msra.mxu0 %v2426_v55 }
 0xabb   : > { %2610 = vmatmul.mubr.msk.f32.vlgmr.msra.gmra.mrb[12].mxu0 %vm724_vm9, %v2608_v28 }
 0xabd   : > { %v2452_v34 = vpop.permute.xlu1 %2451 }
 0xb8e   : > { %v2523_v60 = vpop.f32.mrb[12].mxu0 }
 0xb8f   : > { %v2524_v63 = vadd.f32 %v2523_v60, %v2452_v34  ;;  %v2525_v0 = vpop.f32.mrb[13].mxu0 }
 0xb90   : > { %v2526_v2 = vadd.f32 %v2525_v0, %v2452_v34 }
 0xb91   : > { %v2528_v9 = vadd.f32 %v2524_v63, %v4112_v10 }
 0xb92   : > { %v2529_v1 = vadd.f32 %v2526_v2, %v4115_v17 }
 0xb93   : > { %v2530_v14 = vmul.f32 %v2528_v9, %v4055_v13 }
 0xb94   : > { %v2531_v16 = vmul.f32 %v2529_v1, %v4059_v3 }
 0xb95   : > { %2532 = vst [vmem:[%s305_s23] sm:$0xff] %v2530_v14 }
 0xb96   : > { %2533 = vst.msk [vmem:[%s305_s23 + $0x8] sm:$0xff] %vm724_vm9, %v2531_v16 }
 0xb97 PF: > { %s18_s27 = sadd.s32 1, %s2994_s27  }
 0xb98   : > { %p15_p4 = scmp.ge.s32.totalorder %s18_s27, 4  }
 0xb9a   :  { %17 = sbr.rel (!%p15_p4) target bundleno = 1 (0x1), region = 88 }

</bundles_post_ra>
